<compile_context>
chip_gen: v7x
topology: tpu7x:2x2x1
jax: 0.10.0
libtpu: 0.0.40
codegen_flags: <defaults>
</compile_context>

<pallas_src>
import functools

import jax
import jax.numpy as jnp
from jax.experimental import pallas as pl
from jax.experimental.pallas import tpu as pltpu


# Sublane tile height (second-to-last dim granularity) per itemsize.
_SUBLANE = {4: 8, 2: 16, 1: 32}


def _cdiv(a, b):
    return -(-a // b)


def _round_up(a, b):
    return _cdiv(a, b) * b


def _vmem_capacity_bytes():
    """Physical VMEM per core; conservative 64 MiB if the query fails."""
    try:
        info = pltpu.get_tpu_info()
        cap = getattr(info, "vmem_capacity_bytes", None)
        if cap:
            return int(cap)
    except Exception:
        pass
    return 64 * 1024 * 1024


def _choose_tile_rows(N, H, W, hb, target_slab_bytes, keep_min_steps):
    """Rows per tile so the 3-channel f32 slab ~= target; optionally keep
    >= ~8 grid steps so a 2-TensorCore chip (v7x) has work for both cores."""
    rows = max(hb, (target_slab_bytes // (3 * W * 4) // hb) * hb)
    if keep_min_steps and N * _cdiv(H, rows) < 8:
        need = min(_cdiv(8, N), _cdiv(H, hb))
        if need > 1:
            rows = min(rows, max(hb, _round_up(_cdiv(H, need), hb)))
    return rows


def _grad_kernel_tiled(x_ref, top_ref, bot_ref, o_ref, *, img_h):
    """Row-tiled gradient magnitude.

    Blocks (batch dim squeezed):
      x_ref/o_ref : (3, R, W)   R = tile_rows; the last grid tile may be
                    ragged (only `rv` of its rows are inside the image).
      top_ref     : (3, hb, W)  sublane tile whose LAST row is the row just
                    above this tile (masked to zero for the first tile).
      bot_ref     : (3, hb, W)  sublane tile whose FIRST row is the row just
                    below this tile (masked to zero for the last tile).
    """
    t = pl.program_id(1)
    num_t = pl.num_programs(1)
    _, R, W = x_ref.shape
    hb = top_ref.shape[1]
    f32 = jnp.float32

    # Valid rows in this tile (handles a ragged last tile).
    rv = jnp.minimum(R, img_h - t * R)
    last = jnp.maximum(rv - 1, 0)

    # Border machinery hoisted once per tile: shared by all 3 channels
    # (JAX does not CSE iota/broadcast across the unrolled channel loop).
    col = jax.lax.broadcasted_iota(jnp.int32, (R, W), 1)
    col_first = col == 0
    col_last = col == W - 1
    col_first_1 = col_first[0:1, :]
    col_last_1 = col_last[0:1, :]
    is_top = t == 0
    is_bot = t == num_t - 1

    for c in range(3):  # channels co-resident in VMEM; static unroll
        x = x_ref[c, :, :].astype(f32)

        # 1-row neighbours from the sublane-tile halos (zero at image border).
        up = jnp.where(is_top, 0.0, top_ref[c, hb - 1:hb, :].astype(f32))
        dn = jnp.where(is_bot, 0.0, bot_ref[c, 0:1, :].astype(f32))

        # Horizontal central difference via XLU lane rolls; the lane
        # wrap-around at cols 0 / W-1 is replaced by the exact zero-padded
        # expression (2 selects with hoisted masks).
        h = pltpu.roll(x, W - 1, axis=1) - pltpu.roll(x, 1, axis=1)
        h = jnp.where(col_first, x[:, 1:2], h)           # x[:, 1] - 0
        h = jnp.where(col_last, -x[:, W - 2:W - 1], h)   # 0 - x[:, W-2]

        # Vertical central difference via sublane rolls.  The wrap rows
        # (0 and rv-1) are wrong but are overwritten by the narrow border
        # stores below — cheaper than full-plane selects (v7x VALU budget).
        v = pltpu.roll(x, R - 1, axis=0) - pltpu.roll(x, 1, axis=0)
        o_ref[c, :, :] = jnp.sqrt(v * v + h * h + 1e-6).astype(o_ref.dtype)

        # --- row 0 of the tile (narrow (1, W) fixup) -------------------------
        v0 = x[1:2, :] - up
        h0 = h[0:1, :]
        o_ref[c, 0:1, :] = jnp.sqrt(v0 * v0 + h0 * h0 + 1e-6).astype(o_ref.dtype)

        # --- row rv-1 of the tile (dynamic: last tile may be ragged) ---------
        x_m1 = x_ref[c, pl.ds(last, 1), :].astype(f32)
        x_m2 = x_ref[c, pl.ds(jnp.maximum(rv - 2, 0), 1), :].astype(f32)
        x_m2 = jnp.where(rv >= 2, x_m2, up)   # single-valid-row tile
        hl = pltpu.roll(x_m1, W - 1, axis=1) - pltpu.roll(x_m1, 1, axis=1)
        hl = jnp.where(col_first_1, x_m1[:, 1:2], hl)
        hl = jnp.where(col_last_1, -x_m1[:, W - 2:W - 1], hl)
        vl = dn - x_m2
        o_ref[c, pl.ds(last, 1), :] = jnp.sqrt(
            vl * vl + hl * hl + 1e-6).astype(o_ref.dtype)


def _grad_kernel_single(x_ref, o_ref):
    """Whole-plane path for small images (one (3, H, W) block per image).

    Only selected when the full plane fits the slab budget, so VMEM stays
    bounded.  Handles arbitrary H >= 2 (including H not a sublane multiple).
    """
    _, R, W = x_ref.shape
    col = jax.lax.broadcasted_iota(jnp.int32, (R, W), 1)
    col_first = col == 0
    col_last = col == W - 1
    zr = jnp.zeros((1, W), jnp.float32)
    for c in range(3):
        x = x_ref[c, :, :].astype(jnp.float32)
        h = pltpu.roll(x, W - 1, axis=1) - pltpu.roll(x, 1, axis=1)
        h = jnp.where(col_first, x[:, 1:2], h)
        h = jnp.where(col_last, -x[:, W - 2:W - 1], h)
        # Exact zero-padded vertical difference via sublane concatenation.
        x_dn = jnp.concatenate([x[1:, :], zr], axis=0)    # x[i+1] (0 past end)
        x_up = jnp.concatenate([zr, x[:-1, :]], axis=0)   # x[i-1] (0 above top)
        v = x_dn - x_up
        o_ref[c, :, :] = jnp.sqrt(v * v + h * h + 1e-6).astype(o_ref.dtype)


def get_gradient_nopadding(x, block_rows=None):
    """Pallas TPU forward pass of Get_gradient_nopadding.

    x: (N, C>=3, H, W) floating-point array (NCHW).  Returns (N, 3, H, W).
    """
    N, C, H, W = x.shape
    if C < 3:
        raise ValueError(f"need at least 3 channels, got C={C}")
    if not jnp.issubdtype(x.dtype, jnp.floating):
        raise TypeError(f"expected a floating dtype, got {x.dtype}")
    if H < 2 or W < 2:
        raise ValueError("H and W must both be >= 2")

    itemsize = jnp.dtype(x.dtype).itemsize
    hb = _SUBLANE.get(itemsize, 8)      # halo / alignment tile height

    # Generation-aware budgets: 128-MiB-VMEM parts (v5e/v6e) get larger slabs
    # and a higher scoped-VMEM cap; 64-MiB parts (v7x) get smaller ones and
    # the megacore min-step heuristic (v7x has 2 TCs sharing the grid).
    vmem_cap = _vmem_capacity_bytes()
    small_vmem = vmem_cap < 96 * 1024 * 1024
    target_slab = (6 if small_vmem else 12) * 1024 * 1024
    limit_cap = (48 if small_vmem else 96) * 1024 * 1024

    if block_rows is None:
        tile_rows = _choose_tile_rows(N, H, W, hb, target_slab,
                                      keep_min_steps=small_vmem)
    else:
        if block_rows < H and block_rows % hb != 0:
            raise ValueError(
                f"block_rows={block_rows} must be a multiple of the sublane "
                f"tile ({hb}) when smaller than H={H}")
        tile_rows = block_rows

    out_shape = jax.ShapeDtypeStruct((N, 3, H, W), x.dtype)
    n_elems = N * 3 * H * W

    if tile_rows >= H:
        # Whole plane per image (small images only, so VMEM is bounded).
        # NOTE: pathological H<=sublane with enormous W could exceed VMEM;
        # not tiled along W since it does not occur for image-style inputs.
        grid = (N,)
        in_specs = [pl.BlockSpec((None, 3, H, W), lambda n: (n, 0, 0, 0))]
        out_specs = pl.BlockSpec((None, 3, H, W), lambda n: (n, 0, 0, 0))
        kernel = _grad_kernel_single
        operands = (x,)
        dim_sem = ("parallel",)
        halo_bytes_total = 0
        est = 4 * 3 * H * W * itemsize + 6 * H * W * 4
    else:
        num_tiles = _cdiv(H, tile_rows)           # ragged last tile allowed
        kb = tile_rows // hb                      # hb-blocks per row tile
        nhb = _cdiv(H, hb)                        # hb-blocks along H
        grid = (N, num_tiles)
        in_specs = [
            # main (3, tile_rows, W) slab
            pl.BlockSpec((None, 3, tile_rows, W), lambda n, t: (n, 0, t, 0)),
            # top halo: sublane tile whose last row is t*tile_rows - 1
            pl.BlockSpec((None, 3, hb, W),
                         lambda n, t: (n, 0, jnp.maximum(t * kb - 1, 0), 0)),
            # bottom halo: sublane tile whose first row is (t+1)*tile_rows
            pl.BlockSpec((None, 3, hb, W),
                         lambda n, t: (n, 0, jnp.minimum((t + 1) * kb, nhb - 1), 0)),
        ]
        out_specs = pl.BlockSpec((None, 3, tile_rows, W),
                                 lambda n, t: (n, 0, t, 0))
        kernel = functools.partial(_grad_kernel_tiled, img_h=H)
        operands = (x, x, x)
        dim_sem = ("parallel", "parallel")
        halo_bytes_total = N * num_tiles * 2 * 3 * hb * W * itemsize
        est = (4 * 3 * tile_rows * W * itemsize          # in+out, double-buffered
               + 4 * 2 * 3 * hb * W * itemsize           # halos, double-buffered
               + 6 * tile_rows * W * 4)                  # per-channel f32 temps

    cost = pl.CostEstimate(
        flops=8 * n_elems,
        transcendentals=n_elems,                          # one sqrt per element
        bytes_accessed=2 * n_elems * itemsize + halo_bytes_total)

    vmem_limit = int(min(limit_cap, max(32 * 1024 * 1024, int(est * 1.25))))

    return pl.pallas_call(
        kernel,
        out_shape=out_shape,
        grid=grid,
        in_specs=in_specs,
        out_specs=out_specs,
        compiler_params=pltpu.CompilerParams(
            dimension_semantics=dim_sem,
            vmem_limit_bytes=vmem_limit),
        cost_estimate=cost,
    )(*operands)


def _reference(x):
    """Pure-JAX reference with the module's exact semantics."""
    x3 = x[:, :3].astype(jnp.float32)
    xp = jnp.pad(x3, ((0, 0), (0, 0), (1, 1), (1, 1)))
    v = xp[:, :, 2:, 1:-1] - xp[:, :, :-2, 1:-1]
    h = xp[:, :, 1:-1, 2:] - xp[:, :, 1:-1, :-2]
    return jnp.sqrt(v * v + h * h + 1e-6).astype(x.dtype)


if __name__ == "__main__":
    key = jax.random.PRNGKey(0)
    k1, k2, k3, k4 = jax.random.split(key, 4)

    # Main case (module-style shape): auto tile selection.
    x = jax.random.normal(k1, (2, 4, 16, 16), dtype=jnp.float32)
    out = get_gradient_nopadding(x)
    jax.block_until_ready(out)
    assert out.shape == (2, 3, 16, 16)
    assert jnp.allclose(out, _reference(x), atol=1e-5, rtol=1e-5)

    # Forced row tiling: exercises the halo + narrow-border-store path.
    out_t = get_gradient_nopadding(x, block_rows=8)
    jax.block_until_ready(out_t)
    assert jnp.allclose(out_t, _reference(x), atol=1e-5, rtol=1e-5)

    # Ragged last tile (H=20 -> tiles of 8/8/4 rows).
    x_rag = jax.random.normal(k2, (1, 3, 20, 16), dtype=jnp.float32)
    out_rag = get_gradient_nopadding(x_rag, block_rows=8)
    jax.block_until_ready(out_rag)
    assert jnp.allclose(out_rag, _reference(x_rag), atol=1e-5, rtol=1e-5)

    # Degenerate ragged tail (H=17 -> last tile has a single valid row).
    x_one = jax.random.normal(k3, (1, 3, 17, 16), dtype=jnp.float32)
    out_one = get_gradient_nopadding(x_one, block_rows=8)
    jax.block_until_ready(out_one)
    assert jnp.allclose(out_one, _reference(x_one), atol=1e-5, rtol=1e-5)

    # Small non-sublane-aligned H: whole-plane path.
    x_sm = jax.random.normal(k4, (1, 3, 6, 16), dtype=jnp.float32)
    out_sm = get_gradient_nopadding(x_sm)
    jax.block_until_ready(out_sm)
    assert jnp.allclose(out_sm, _reference(x_sm), atol=1e-5, rtol=1e-5)

    print("KERNEL_OK")
</pallas_src>

<mosaic_0001>
module attributes {stable_mosaic.version = 11 : i64} {
  func.func @_grad_kernel_tiled(%arg0: i32, %arg1: i32, %arg2: memref<1x3x8x16xf32, #tpu.memory_space<vmem>>, %arg3: memref<1x3x8x16xf32, #tpu.memory_space<vmem>>, %arg4: memref<1x3x8x16xf32, #tpu.memory_space<vmem>>, %arg5: memref<1x3x8x16xf32, #tpu.memory_space<vmem>>) attributes {dimension_semantics = [#tpu.dimension_semantics<parallel>, #tpu.dimension_semantics<parallel>], iteration_bounds = array<i64: 2, 2>, scalar_prefetch = 0 : i64, scratch_operands = 0 : i64, tpu.core_type = #tpu.core_type<tc>, window_params = [{transform_indices = @transform_0, window_bounds = array<i64: 1, 3, 8, 16>}, {transform_indices = @transform_1, window_bounds = array<i64: 1, 3, 8, 16>}, {transform_indices = @transform_2, window_bounds = array<i64: 1, 3, 8, 16>}, {transform_indices = @transform_3, window_bounds = array<i64: 1, 3, 8, 16>}]} {
    %c8_i32 = arith.constant 8 : i32
    %0 = arith.muli %arg1, %c8_i32 : i32
    %c16_i32 = arith.constant 16 : i32
    %1 = arith.subi %c16_i32, %0 : i32
    %c8_i32_0 = arith.constant 8 : i32
    %2 = arith.minsi %c8_i32_0, %1 : i32
    %c1_i32 = arith.constant 1 : i32
    %3 = arith.subi %2, %c1_i32 : i32
    %c0_i32 = arith.constant 0 : i32
    %4 = arith.maxsi %3, %c0_i32 : i32
    %5 = tpu.iota {dimensions = array<i32: 1>} : vector<8x16xi32>
    %c0_i32_1 = arith.constant 0 : i32
    %6 = vector.broadcast %c0_i32_1 : i32 to vector<8x16xi32>
    %7 = arith.cmpi eq, %5, %6 : vector<8x16xi32>
    %c15_i32 = arith.constant 15 : i32
    %8 = vector.broadcast %c15_i32 : i32 to vector<8x16xi32>
    %9 = arith.cmpi eq, %5, %8 : vector<8x16xi32>
    %10 = vector.extract_strided_slice %7 {offsets = [0, 0], sizes = [1, 16], strides = [1, 1]} : vector<8x16xi1> to vector<1x16xi1>
    %11 = vector.extract_strided_slice %9 {offsets = [0, 0], sizes = [1, 16], strides = [1, 1]} : vector<8x16xi1> to vector<1x16xi1>
    %c0_i32_2 = arith.constant 0 : i32
    %12 = arith.cmpi eq, %arg1, %c0_i32_2 : i32
    %c1_i32_3 = arith.constant 1 : i32
    %13 = arith.cmpi eq, %arg1, %c1_i32_3 : i32
    %c0 = arith.constant 0 : index
    %c0_4 = arith.constant 0 : index
    %c0_5 = arith.constant 0 : index
    %c0_6 = arith.constant 0 : index
    %14 = vector.load %arg2[%c0, %c0_4, %c0_5, %c0_6] : memref<1x3x8x16xf32, #tpu.memory_space<vmem>>, vector<1x1x8x16xf32>
    %15 = vector.shape_cast %14 : vector<1x1x8x16xf32> to vector<8x16xf32>
    %c0_7 = arith.constant 0 : index
    %c0_8 = arith.constant 0 : index
    %c7 = arith.constant 7 : index
    %c0_9 = arith.constant 0 : index
    %16 = vector.load %arg3[%c0_7, %c0_8, %c7, %c0_9] : memref<1x3x8x16xf32, #tpu.memory_space<vmem>>, vector<1x1x1x16xf32>
    %17 = vector.shape_cast %16 : vector<1x1x1x16xf32> to vector<1x16xf32>
    %cst = arith.constant 0.000000e+00 : f32
    %18 = vector.broadcast %cst : f32 to vector<1x16xf32>
    %19 = arith.select %12, %18, %17 : vector<1x16xf32>
    %c0_10 = arith.constant 0 : index
    %c0_11 = arith.constant 0 : index
    %c0_12 = arith.constant 0 : index
    %c0_13 = arith.constant 0 : index
    %20 = vector.load %arg4[%c0_10, %c0_11, %c0_12, %c0_13] : memref<1x3x8x16xf32, #tpu.memory_space<vmem>>, vector<1x1x1x16xf32>
    %21 = vector.shape_cast %20 : vector<1x1x1x16xf32> to vector<1x16xf32>
    %cst_14 = arith.constant 0.000000e+00 : f32
    %22 = vector.broadcast %cst_14 : f32 to vector<1x16xf32>
    %23 = arith.select %13, %22, %21 : vector<1x16xf32>
    %c15_i32_15 = arith.constant 15 : i32
    %24 = tpu.dynamic_rotate %15 by %c15_i32_15 dim 1 : vector<8x16xf32>, i32 -> vector<8x16xf32>
    %c1_i32_16 = arith.constant 1 : i32
    %25 = tpu.dynamic_rotate %15 by %c1_i32_16 dim 1 : vector<8x16xf32>, i32 -> vector<8x16xf32>
    %26 = arith.subf %24, %25 : vector<8x16xf32>
    %27 = vector.extract_strided_slice %15 {offsets = [0, 1], sizes = [8, 1], strides = [1, 1]} : vector<8x16xf32> to vector<8x1xf32>
    %28 = vector.shape_cast %27 : vector<8x1xf32> to vector<8x1xf32>
    %29 = vector.broadcast %28 : vector<8x1xf32> to vector<8x16xf32>
    %30 = arith.select %7, %29, %26 : vector<8x16xi1>, vector<8x16xf32>
    %31 = vector.extract_strided_slice %15 {offsets = [0, 14], sizes = [8, 1], strides = [1, 1]} : vector<8x16xf32> to vector<8x1xf32>
    %cst_17 = arith.constant 0.000000e+00 : f32
    %32 = vector.broadcast %cst_17 : f32 to vector<8x1xf32>
    %33 = arith.subf %32, %31 : vector<8x1xf32>
    %34 = vector.shape_cast %33 : vector<8x1xf32> to vector<8x1xf32>
    %35 = vector.broadcast %34 : vector<8x1xf32> to vector<8x16xf32>
    %36 = arith.select %9, %35, %30 : vector<8x16xi1>, vector<8x16xf32>
    %c7_i32 = arith.constant 7 : i32
    %37 = tpu.dynamic_rotate %15 by %c7_i32 dim 0 : vector<8x16xf32>, i32 -> vector<8x16xf32>
    %c1_i32_18 = arith.constant 1 : i32
    %38 = tpu.dynamic_rotate %15 by %c1_i32_18 dim 0 : vector<8x16xf32>, i32 -> vector<8x16xf32>
    %39 = arith.subf %37, %38 : vector<8x16xf32>
    %40 = arith.mulf %39, %39 : vector<8x16xf32>
    %41 = arith.mulf %36, %36 : vector<8x16xf32>
    %42 = arith.addf %40, %41 : vector<8x16xf32>
    %cst_19 = arith.constant 9.99999997E-7 : f32
    %43 = vector.broadcast %cst_19 : f32 to vector<8x16xf32>
    %44 = arith.addf %42, %43 : vector<8x16xf32>
    %45 = math.sqrt %44 : vector<8x16xf32>
    %c0_20 = arith.constant 0 : index
    %c0_21 = arith.constant 0 : index
    %c0_22 = arith.constant 0 : index
    %c0_23 = arith.constant 0 : index
    %46 = vector.load %arg5[%c0_20, %c0_21, %c0_22, %c0_23] : memref<1x3x8x16xf32, #tpu.memory_space<vmem>>, vector<1x1x8x16xf32>
    %47 = vector.shape_cast %46 : vector<1x1x8x16xf32> to vector<8x16xf32>
    %48 = vector.shape_cast %45 : vector<8x16xf32> to vector<1x1x8x16xf32>
    tpu.vector_store %arg5[%c0_20, %c0_21, %c0_22, %c0_23], %48 {strides = array<i32>} : memref<1x3x8x16xf32, #tpu.memory_space<vmem>>, vector<1x1x8x16xf32>,
    %49 = vector.extract_strided_slice %15 {offsets = [1, 0], sizes = [1, 16], strides = [1, 1]} : vector<8x16xf32> to vector<1x16xf32>
    %50 = arith.subf %49, %19 : vector<1x16xf32>
    %51 = vector.extract_strided_slice %36 {offsets = [0, 0], sizes = [1, 16], strides = [1, 1]} : vector<8x16xf32> to vector<1x16xf32>
    %52 = arith.mulf %50, %50 : vector<1x16xf32>
    %53 = arith.mulf %51, %51 : vector<1x16xf32>
    %54 = arith.addf %52, %53 : vector<1x16xf32>
    %cst_24 = arith.constant 9.99999997E-7 : f32
    %55 = vector.broadcast %cst_24 : f32 to vector<1x16xf32>
    %56 = arith.addf %54, %55 : vector<1x16xf32>
    %57 = math.sqrt %56 : vector<1x16xf32>
    %c0_25 = arith.constant 0 : index
    %c0_26 = arith.constant 0 : index
    %c0_27 = arith.constant 0 : index
    %c0_28 = arith.constant 0 : index
    %58 = vector.load %arg5[%c0_25, %c0_26, %c0_27, %c0_28] : memref<1x3x8x16xf32, #tpu.memory_space<vmem>>, vector<1x1x1x16xf32>
    %59 = vector.shape_cast %58 : vector<1x1x1x16xf32> to vector<1x16xf32>
    %60 = vector.shape_cast %57 : vector<1x16xf32> to vector<1x1x1x16xf32>
    tpu.vector_store %arg5[%c0_25, %c0_26, %c0_27, %c0_28], %60 {strides = array<i32>} : memref<1x3x8x16xf32, #tpu.memory_space<vmem>>, vector<1x1x1x16xf32>,
    %c0_29 = arith.constant 0 : index
    %c0_30 = arith.constant 0 : index
    %61 = arith.index_cast %4 : i32 to index
    %c0_31 = arith.constant 0 : index
    %62 = vector.load %arg2[%c0_29, %c0_30, %61, %c0_31] : memref<1x3x8x16xf32, #tpu.memory_space<vmem>>, vector<1x1x1x16xf32>
    %63 = vector.shape_cast %62 : vector<1x1x1x16xf32> to vector<1x16xf32>
    %c2_i32 = arith.constant 2 : i32
    %64 = arith.subi %2, %c2_i32 : i32
    %c0_i32_32 = arith.constant 0 : i32
    %65 = arith.maxsi %64, %c0_i32_32 : i32
    %c0_33 = arith.constant 0 : index
    %c0_34 = arith.constant 0 : index
    %66 = arith.index_cast %65 : i32 to index
    %c0_35 = arith.constant 0 : index
    %67 = vector.load %arg2[%c0_33, %c0_34, %66, %c0_35] : memref<1x3x8x16xf32, #tpu.memory_space<vmem>>, vector<1x1x1x16xf32>
    %68 = vector.shape_cast %67 : vector<1x1x1x16xf32> to vector<1x16xf32>
    %c2_i32_36 = arith.constant 2 : i32
    %69 = arith.cmpi sge, %2, %c2_i32_36 : i32
    %70 = arith.select %69, %68, %19 : vector<1x16xf32>
    %c15_i32_37 = arith.constant 15 : i32
    %71 = tpu.dynamic_rotate %63 by %c15_i32_37 dim 1 : vector<1x16xf32>, i32 -> vector<1x16xf32>
    %c1_i32_38 = arith.constant 1 : i32
    %72 = tpu.dynamic_rotate %63 by %c1_i32_38 dim 1 : vector<1x16xf32>, i32 -> vector<1x16xf32>
    %73 = arith.subf %71, %72 : vector<1x16xf32>
    %74 = vector.extract_strided_slice %63 {offsets = [0, 1], sizes = [1, 1], strides = [1, 1]} : vector<1x16xf32> to vector<1x1xf32>
    %75 = vector.shape_cast %74 : vector<1x1xf32> to vector<1x1xf32>
    %76 = vector.broadcast %75 : vector<1x1xf32> to vector<1x16xf32>
    %77 = arith.select %10, %76, %73 : vector<1x16xi1>, vector<1x16xf32>
    %78 = vector.extract_strided_slice %63 {offsets = [0, 14], sizes = [1, 1], strides = [1, 1]} : vector<1x16xf32> to vector<1x1xf32>
    %cst_39 = arith.constant 0.000000e+00 : f32
    %79 = vector.broadcast %cst_39 : f32 to vector<1x1xf32>
    %80 = arith.subf %79, %78 : vector<1x1xf32>
    %81 = vector.shape_cast %80 : vector<1x1xf32> to vector<1x1xf32>
    %82 = vector.broadcast %81 : vector<1x1xf32> to vector<1x16xf32>
    %83 = arith.select %11, %82, %77 : vector<1x16xi1>, vector<1x16xf32>
    %84 = arith.subf %23, %70 : vector<1x16xf32>
    %85 = arith.mulf %84, %84 : vector<1x16xf32>
    %86 = arith.mulf %83, %83 : vector<1x16xf32>
    %87 = arith.addf %85, %86 : vector<1x16xf32>
    %cst_40 = arith.constant 9.99999997E-7 : f32
    %88 = vector.broadcast %cst_40 : f32 to vector<1x16xf32>
    %89 = arith.addf %87, %88 : vector<1x16xf32>
    %90 = math.sqrt %89 : vector<1x16xf32>
    %c0_41 = arith.constant 0 : index
    %c0_42 = arith.constant 0 : index
    %91 = arith.index_cast %4 : i32 to index
    %c0_43 = arith.constant 0 : index
    %92 = vector.load %arg5[%c0_41, %c0_42, %91, %c0_43] : memref<1x3x8x16xf32, #tpu.memory_space<vmem>>, vector<1x1x1x16xf32>
    %93 = vector.shape_cast %92 : vector<1x1x1x16xf32> to vector<1x16xf32>
    %94 = vector.shape_cast %90 : vector<1x16xf32> to vector<1x1x1x16xf32>
    tpu.vector_store %arg5[%c0_41, %c0_42, %91, %c0_43], %94 {strides = array<i32>} : memref<1x3x8x16xf32, #tpu.memory_space<vmem>>, vector<1x1x1x16xf32>,
    %c0_44 = arith.constant 0 : index
    %c1 = arith.constant 1 : index
    %c0_45 = arith.constant 0 : index
    %c0_46 = arith.constant 0 : index
    %95 = vector.load %arg2[%c0_44, %c1, %c0_45, %c0_46] : memref<1x3x8x16xf32, #tpu.memory_space<vmem>>, vector<1x1x8x16xf32>
    %96 = vector.shape_cast %95 : vector<1x1x8x16xf32> to vector<8x16xf32>
    %c0_47 = arith.constant 0 : index
    %c1_48 = arith.constant 1 : index
    %c7_49 = arith.constant 7 : index
    %c0_50 = arith.constant 0 : index
    %97 = vector.load %arg3[%c0_47, %c1_48, %c7_49, %c0_50] : memref<1x3x8x16xf32, #tpu.memory_space<vmem>>, vector<1x1x1x16xf32>
    %98 = vector.shape_cast %97 : vector<1x1x1x16xf32> to vector<1x16xf32>
    %cst_51 = arith.constant 0.000000e+00 : f32
    %99 = vector.broadcast %cst_51 : f32 to vector<1x16xf32>
    %100 = arith.select %12, %99, %98 : vector<1x16xf32>
    %c0_52 = arith.constant 0 : index
    %c1_53 = arith.constant 1 : index
    %c0_54 = arith.constant 0 : index
    %c0_55 = arith.constant 0 : index
    %101 = vector.load %arg4[%c0_52, %c1_53, %c0_54, %c0_55] : memref<1x3x8x16xf32, #tpu.memory_space<vmem>>, vector<1x1x1x16xf32>
    %102 = vector.shape_cast %101 : vector<1x1x1x16xf32> to vector<1x16xf32>
    %cst_56 = arith.constant 0.000000e+00 : f32
    %103 = vector.broadcast %cst_56 : f32 to vector<1x16xf32>
    %104 = arith.select %13, %103, %102 : vector<1x16xf32>
    %c15_i32_57 = arith.constant 15 : i32
    %105 = tpu.dynamic_rotate %96 by %c15_i32_57 dim 1 : vector<8x16xf32>, i32 -> vector<8x16xf32>
    %c1_i32_58 = arith.constant 1 : i32
    %106 = tpu.dynamic_rotate %96 by %c1_i32_58 dim 1 : vector<8x16xf32>, i32 -> vector<8x16xf32>
    %107 = arith.subf %105, %106 : vector<8x16xf32>
    %108 = vector.extract_strided_slice %96 {offsets = [0, 1], sizes = [8, 1], strides = [1, 1]} : vector<8x16xf32> to vector<8x1xf32>
    %109 = vector.shape_cast %108 : vector<8x1xf32> to vector<8x1xf32>
    %110 = vector.broadcast %109 : vector<8x1xf32> to vector<8x16xf32>
    %111 = arith.select %7, %110, %107 : vector<8x16xi1>, vector<8x16xf32>
    %112 = vector.extract_strided_slice %96 {offsets = [0, 14], sizes = [8, 1], strides = [1, 1]} : vector<8x16xf32> to vector<8x1xf32>
    %cst_59 = arith.constant 0.000000e+00 : f32
    %113 = vector.broadcast %cst_59 : f32 to vector<8x1xf32>
    %114 = arith.subf %113, %112 : vector<8x1xf32>
    %115 = vector.shape_cast %114 : vector<8x1xf32> to vector<8x1xf32>
    %116 = vector.broadcast %115 : vector<8x1xf32> to vector<8x16xf32>
    %117 = arith.select %9, %116, %111 : vector<8x16xi1>, vector<8x16xf32>
    %c7_i32_60 = arith.constant 7 : i32
    %118 = tpu.dynamic_rotate %96 by %c7_i32_60 dim 0 : vector<8x16xf32>, i32 -> vector<8x16xf32>
    %c1_i32_61 = arith.constant 1 : i32
    %119 = tpu.dynamic_rotate %96 by %c1_i32_61 dim 0 : vector<8x16xf32>, i32 -> vector<8x16xf32>
    %120 = arith.subf %118, %119 : vector<8x16xf32>
    %121 = arith.mulf %120, %120 : vector<8x16xf32>
    %122 = arith.mulf %117, %117 : vector<8x16xf32>
    %123 = arith.addf %121, %122 : vector<8x16xf32>
    %cst_62 = arith.constant 9.99999997E-7 : f32
    %124 = vector.broadcast %cst_62 : f32 to vector<8x16xf32>
    %125 = arith.addf %123, %124 : vector<8x16xf32>
    %126 = math.sqrt %125 : vector<8x16xf32>
    %c0_63 = arith.constant 0 : index
    %c1_64 = arith.constant 1 : index
    %c0_65 = arith.constant 0 : index
    %c0_66 = arith.constant 0 : index
    %127 = vector.load %arg5[%c0_63, %c1_64, %c0_65, %c0_66] : memref<1x3x8x16xf32, #tpu.memory_space<vmem>>, vector<1x1x8x16xf32>
    %128 = vector.shape_cast %127 : vector<1x1x8x16xf32> to vector<8x16xf32>
    %129 = vector.shape_cast %126 : vector<8x16xf32> to vector<1x1x8x16xf32>
    tpu.vector_store %arg5[%c0_63, %c1_64, %c0_65, %c0_66], %129 {strides = array<i32>} : memref<1x3x8x16xf32, #tpu.memory_space<vmem>>, vector<1x1x8x16xf32>,
    %130 = vector.extract_strided_slice %96 {offsets = [1, 0], sizes = [1, 16], strides = [1, 1]} : vector<8x16xf32> to vector<1x16xf32>
    %131 = arith.subf %130, %100 : vector<1x16xf32>
    %132 = vector.extract_strided_slice %117 {offsets = [0, 0], sizes = [1, 16], strides = [1, 1]} : vector<8x16xf32> to vector<1x16xf32>
    %133 = arith.mulf %131, %131 : vector<1x16xf32>
    %134 = arith.mulf %132, %132 : vector<1x16xf32>
    %135 = arith.addf %133, %134 : vector<1x16xf32>
    %cst_67 = arith.constant 9.99999997E-7 : f32
    %136 = vector.broadcast %cst_67 : f32 to vector<1x16xf32>
    %137 = arith.addf %135, %136 : vector<1x16xf32>
    %138 = math.sqrt %137 : vector<1x16xf32>
    %c0_68 = arith.constant 0 : index
    %c1_69 = arith.constant 1 : index
    %c0_70 = arith.constant 0 : index
    %c0_71 = arith.constant 0 : index
    %139 = vector.load %arg5[%c0_68, %c1_69, %c0_70, %c0_71] : memref<1x3x8x16xf32, #tpu.memory_space<vmem>>, vector<1x1x1x16xf32>
    %140 = vector.shape_cast %139 : vector<1x1x1x16xf32> to vector<1x16xf32>
    %141 = vector.shape_cast %138 : vector<1x16xf32> to vector<1x1x1x16xf32>
    tpu.vector_store %arg5[%c0_68, %c1_69, %c0_70, %c0_71], %141 {strides = array<i32>} : memref<1x3x8x16xf32, #tpu.memory_space<vmem>>, vector<1x1x1x16xf32>,
    %c0_72 = arith.constant 0 : index
    %c1_73 = arith.constant 1 : index
    %142 = arith.index_cast %4 : i32 to index
    %c0_74 = arith.constant 0 : index
    %143 = vector.load %arg2[%c0_72, %c1_73, %142, %c0_74] : memref<1x3x8x16xf32, #tpu.memory_space<vmem>>, vector<1x1x1x16xf32>
    %144 = vector.shape_cast %143 : vector<1x1x1x16xf32> to vector<1x16xf32>
    %c2_i32_75 = arith.constant 2 : i32
    %145 = arith.subi %2, %c2_i32_75 : i32
    %c0_i32_76 = arith.constant 0 : i32
    %146 = arith.maxsi %145, %c0_i32_76 : i32
    %c0_77 = arith.constant 0 : index
    %c1_78 = arith.constant 1 : index
    %147 = arith.index_cast %146 : i32 to index
    %c0_79 = arith.constant 0 : index
    %148 = vector.load %arg2[%c0_77, %c1_78, %147, %c0_79] : memref<1x3x8x16xf32, #tpu.memory_space<vmem>>, vector<1x1x1x16xf32>
    %149 = vector.shape_cast %148 : vector<1x1x1x16xf32> to vector<1x16xf32>
    %c2_i32_80 = arith.constant 2 : i32
    %150 = arith.cmpi sge, %2, %c2_i32_80 : i32
    %151 = arith.select %150, %149, %100 : vector<1x16xf32>
    %c15_i32_81 = arith.constant 15 : i32
    %152 = tpu.dynamic_rotate %144 by %c15_i32_81 dim 1 : vector<1x16xf32>, i32 -> vector<1x16xf32>
    %c1_i32_82 = arith.constant 1 : i32
    %153 = tpu.dynamic_rotate %144 by %c1_i32_82 dim 1 : vector<1x16xf32>, i32 -> vector<1x16xf32>
    %154 = arith.subf %152, %153 : vector<1x16xf32>
    %155 = vector.extract_strided_slice %144 {offsets = [0, 1], sizes = [1, 1], strides = [1, 1]} : vector<1x16xf32> to vector<1x1xf32>
    %156 = vector.shape_cast %155 : vector<1x1xf32> to vector<1x1xf32>
    %157 = vector.broadcast %156 : vector<1x1xf32> to vector<1x16xf32>
    %158 = arith.select %10, %157, %154 : vector<1x16xi1>, vector<1x16xf32>
    %159 = vector.extract_strided_slice %144 {offsets = [0, 14], sizes = [1, 1], strides = [1, 1]} : vector<1x16xf32> to vector<1x1xf32>
    %cst_83 = arith.constant 0.000000e+00 : f32
    %160 = vector.broadcast %cst_83 : f32 to vector<1x1xf32>
    %161 = arith.subf %160, %159 : vector<1x1xf32>
    %162 = vector.shape_cast %161 : vector<1x1xf32> to vector<1x1xf32>
    %163 = vector.broadcast %162 : vector<1x1xf32> to vector<1x16xf32>
    %164 = arith.select %11, %163, %158 : vector<1x16xi1>, vector<1x16xf32>
    %165 = arith.subf %104, %151 : vector<1x16xf32>
    %166 = arith.mulf %165, %165 : vector<1x16xf32>
    %167 = arith.mulf %164, %164 : vector<1x16xf32>
    %168 = arith.addf %166, %167 : vector<1x16xf32>
    %cst_84 = arith.constant 9.99999997E-7 : f32
    %169 = vector.broadcast %cst_84 : f32 to vector<1x16xf32>
    %170 = arith.addf %168, %169 : vector<1x16xf32>
    %171 = math.sqrt %170 : vector<1x16xf32>
    %c0_85 = arith.constant 0 : index
    %c1_86 = arith.constant 1 : index
    %172 = arith.index_cast %4 : i32 to index
    %c0_87 = arith.constant 0 : index
    %173 = vector.load %arg5[%c0_85, %c1_86, %172, %c0_87] : memref<1x3x8x16xf32, #tpu.memory_space<vmem>>, vector<1x1x1x16xf32>
    %174 = vector.shape_cast %173 : vector<1x1x1x16xf32> to vector<1x16xf32>
    %175 = vector.shape_cast %171 : vector<1x16xf32> to vector<1x1x1x16xf32>
    tpu.vector_store %arg5[%c0_85, %c1_86, %172, %c0_87], %175 {strides = array<i32>} : memref<1x3x8x16xf32, #tpu.memory_space<vmem>>, vector<1x1x1x16xf32>,
    %c0_88 = arith.constant 0 : index
    %c2 = arith.constant 2 : index
    %c0_89 = arith.constant 0 : index
    %c0_90 = arith.constant 0 : index
    %176 = vector.load %arg2[%c0_88, %c2, %c0_89, %c0_90] : memref<1x3x8x16xf32, #tpu.memory_space<vmem>>, vector<1x1x8x16xf32>
    %177 = vector.shape_cast %176 : vector<1x1x8x16xf32> to vector<8x16xf32>
    %c0_91 = arith.constant 0 : index
    %c2_92 = arith.constant 2 : index
    %c7_93 = arith.constant 7 : index
    %c0_94 = arith.constant 0 : index
    %178 = vector.load %arg3[%c0_91, %c2_92, %c7_93, %c0_94] : memref<1x3x8x16xf32, #tpu.memory_space<vmem>>, vector<1x1x1x16xf32>
    %179 = vector.shape_cast %178 : vector<1x1x1x16xf32> to vector<1x16xf32>
    %cst_95 = arith.constant 0.000000e+00 : f32
    %180 = vector.broadcast %cst_95 : f32 to vector<1x16xf32>
    %181 = arith.select %12, %180, %179 : vector<1x16xf32>
    %c0_96 = arith.constant 0 : index
    %c2_97 = arith.constant 2 : index
    %c0_98 = arith.constant 0 : index
    %c0_99 = arith.constant 0 : index
    %182 = vector.load %arg4[%c0_96, %c2_97, %c0_98, %c0_99] : memref<1x3x8x16xf32, #tpu.memory_space<vmem>>, vector<1x1x1x16xf32>
    %183 = vector.shape_cast %182 : vector<1x1x1x16xf32> to vector<1x16xf32>
    %cst_100 = arith.constant 0.000000e+00 : f32
    %184 = vector.broadcast %cst_100 : f32 to vector<1x16xf32>
    %185 = arith.select %13, %184, %183 : vector<1x16xf32>
    %c15_i32_101 = arith.constant 15 : i32
    %186 = tpu.dynamic_rotate %177 by %c15_i32_101 dim 1 : vector<8x16xf32>, i32 -> vector<8x16xf32>
    %c1_i32_102 = arith.constant 1 : i32
    %187 = tpu.dynamic_rotate %177 by %c1_i32_102 dim 1 : vector<8x16xf32>, i32 -> vector<8x16xf32>
    %188 = arith.subf %186, %187 : vector<8x16xf32>
    %189 = vector.extract_strided_slice %177 {offsets = [0, 1], sizes = [8, 1], strides = [1, 1]} : vector<8x16xf32> to vector<8x1xf32>
    %190 = vector.shape_cast %189 : vector<8x1xf32> to vector<8x1xf32>
    %191 = vector.broadcast %190 : vector<8x1xf32> to vector<8x16xf32>
    %192 = arith.select %7, %191, %188 : vector<8x16xi1>, vector<8x16xf32>
    %193 = vector.extract_strided_slice %177 {offsets = [0, 14], sizes = [8, 1], strides = [1, 1]} : vector<8x16xf32> to vector<8x1xf32>
    %cst_103 = arith.constant 0.000000e+00 : f32
    %194 = vector.broadcast %cst_103 : f32 to vector<8x1xf32>
    %195 = arith.subf %194, %193 : vector<8x1xf32>
    %196 = vector.shape_cast %195 : vector<8x1xf32> to vector<8x1xf32>
    %197 = vector.broadcast %196 : vector<8x1xf32> to vector<8x16xf32>
    %198 = arith.select %9, %197, %192 : vector<8x16xi1>, vector<8x16xf32>
    %c7_i32_104 = arith.constant 7 : i32
    %199 = tpu.dynamic_rotate %177 by %c7_i32_104 dim 0 : vector<8x16xf32>, i32 -> vector<8x16xf32>
    %c1_i32_105 = arith.constant 1 : i32
    %200 = tpu.dynamic_rotate %177 by %c1_i32_105 dim 0 : vector<8x16xf32>, i32 -> vector<8x16xf32>
    %201 = arith.subf %199, %200 : vector<8x16xf32>
    %202 = arith.mulf %201, %201 : vector<8x16xf32>
    %203 = arith.mulf %198, %198 : vector<8x16xf32>
    %204 = arith.addf %202, %203 : vector<8x16xf32>
    %cst_106 = arith.constant 9.99999997E-7 : f32
    %205 = vector.broadcast %cst_106 : f32 to vector<8x16xf32>
    %206 = arith.addf %204, %205 : vector<8x16xf32>
    %207 = math.sqrt %206 : vector<8x16xf32>
    %c0_107 = arith.constant 0 : index
    %c2_108 = arith.constant 2 : index
    %c0_109 = arith.constant 0 : index
    %c0_110 = arith.constant 0 : index
    %208 = vector.load %arg5[%c0_107, %c2_108, %c0_109, %c0_110] : memref<1x3x8x16xf32, #tpu.memory_space<vmem>>, vector<1x1x8x16xf32>
    %209 = vector.shape_cast %208 : vector<1x1x8x16xf32> to vector<8x16xf32>
    %210 = vector.shape_cast %207 : vector<8x16xf32> to vector<1x1x8x16xf32>
    tpu.vector_store %arg5[%c0_107, %c2_108, %c0_109, %c0_110], %210 {strides = array<i32>} : memref<1x3x8x16xf32, #tpu.memory_space<vmem>>, vector<1x1x8x16xf32>,
    %211 = vector.extract_strided_slice %177 {offsets = [1, 0], sizes = [1, 16], strides = [1, 1]} : vector<8x16xf32> to vector<1x16xf32>
    %212 = arith.subf %211, %181 : vector<1x16xf32>
    %213 = vector.extract_strided_slice %198 {offsets = [0, 0], sizes = [1, 16], strides = [1, 1]} : vector<8x16xf32> to vector<1x16xf32>
    %214 = arith.mulf %212, %212 : vector<1x16xf32>
    %215 = arith.mulf %213, %213 : vector<1x16xf32>
    %216 = arith.addf %214, %215 : vector<1x16xf32>
    %cst_111 = arith.constant 9.99999997E-7 : f32
    %217 = vector.broadcast %cst_111 : f32 to vector<1x16xf32>
    %218 = arith.addf %216, %217 : vector<1x16xf32>
    %219 = math.sqrt %218 : vector<1x16xf32>
    %c0_112 = arith.constant 0 : index
    %c2_113 = arith.constant 2 : index
    %c0_114 = arith.constant 0 : index
    %c0_115 = arith.constant 0 : index
    %220 = vector.load %arg5[%c0_112, %c2_113, %c0_114, %c0_115] : memref<1x3x8x16xf32, #tpu.memory_space<vmem>>, vector<1x1x1x16xf32>
    %221 = vector.shape_cast %220 : vector<1x1x1x16xf32> to vector<1x16xf32>
    %222 = vector.shape_cast %219 : vector<1x16xf32> to vector<1x1x1x16xf32>
    tpu.vector_store %arg5[%c0_112, %c2_113, %c0_114, %c0_115], %222 {strides = array<i32>} : memref<1x3x8x16xf32, #tpu.memory_space<vmem>>, vector<1x1x1x16xf32>,
    %c0_116 = arith.constant 0 : index
    %c2_117 = arith.constant 2 : index
    %223 = arith.index_cast %4 : i32 to index
    %c0_118 = arith.constant 0 : index
    %224 = vector.load %arg2[%c0_116, %c2_117, %223, %c0_118] : memref<1x3x8x16xf32, #tpu.memory_space<vmem>>, vector<1x1x1x16xf32>
    %225 = vector.shape_cast %224 : vector<1x1x1x16xf32> to vector<1x16xf32>
    %c2_i32_119 = arith.constant 2 : i32
    %226 = arith.subi %2, %c2_i32_119 : i32
    %c0_i32_120 = arith.constant 0 : i32
    %227 = arith.maxsi %226, %c0_i32_120 : i32
    %c0_121 = arith.constant 0 : index
    %c2_122 = arith.constant 2 : index
    %228 = arith.index_cast %227 : i32 to index
    %c0_123 = arith.constant 0 : index
    %229 = vector.load %arg2[%c0_121, %c2_122, %228, %c0_123] : memref<1x3x8x16xf32, #tpu.memory_space<vmem>>, vector<1x1x1x16xf32>
    %230 = vector.shape_cast %229 : vector<1x1x1x16xf32> to vector<1x16xf32>
    %c2_i32_124 = arith.constant 2 : i32
    %231 = arith.cmpi sge, %2, %c2_i32_124 : i32
    %232 = arith.select %231, %230, %181 : vector<1x16xf32>
    %c15_i32_125 = arith.constant 15 : i32
    %233 = tpu.dynamic_rotate %225 by %c15_i32_125 dim 1 : vector<1x16xf32>, i32 -> vector<1x16xf32>
    %c1_i32_126 = arith.constant 1 : i32
    %234 = tpu.dynamic_rotate %225 by %c1_i32_126 dim 1 : vector<1x16xf32>, i32 -> vector<1x16xf32>
    %235 = arith.subf %233, %234 : vector<1x16xf32>
    %236 = vector.extract_strided_slice %225 {offsets = [0, 1], sizes = [1, 1], strides = [1, 1]} : vector<1x16xf32> to vector<1x1xf32>
    %237 = vector.shape_cast %236 : vector<1x1xf32> to vector<1x1xf32>
    %238 = vector.broadcast %237 : vector<1x1xf32> to vector<1x16xf32>
    %239 = arith.select %10, %238, %235 : vector<1x16xi1>, vector<1x16xf32>
    %240 = vector.extract_strided_slice %225 {offsets = [0, 14], sizes = [1, 1], strides = [1, 1]} : vector<1x16xf32> to vector<1x1xf32>
    %cst_127 = arith.constant 0.000000e+00 : f32
    %241 = vector.broadcast %cst_127 : f32 to vector<1x1xf32>
    %242 = arith.subf %241, %240 : vector<1x1xf32>
    %243 = vector.shape_cast %242 : vector<1x1xf32> to vector<1x1xf32>
    %244 = vector.broadcast %243 : vector<1x1xf32> to vector<1x16xf32>
    %245 = arith.select %11, %244, %239 : vector<1x16xi1>, vector<1x16xf32>
    %246 = arith.subf %185, %232 : vector<1x16xf32>
    %247 = arith.mulf %246, %246 : vector<1x16xf32>
    %248 = arith.mulf %245, %245 : vector<1x16xf32>
    %249 = arith.addf %247, %248 : vector<1x16xf32>
    %cst_128 = arith.constant 9.99999997E-7 : f32
    %250 = vector.broadcast %cst_128 : f32 to vector<1x16xf32>
    %251 = arith.addf %249, %250 : vector<1x16xf32>
    %252 = math.sqrt %251 : vector<1x16xf32>
    %c0_129 = arith.constant 0 : index
    %c2_130 = arith.constant 2 : index
    %253 = arith.index_cast %4 : i32 to index
    %c0_131 = arith.constant 0 : index
    %254 = vector.load %arg5[%c0_129, %c2_130, %253, %c0_131] : memref<1x3x8x16xf32, #tpu.memory_space<vmem>>, vector<1x1x1x16xf32>
    %255 = vector.shape_cast %254 : vector<1x1x1x16xf32> to vector<1x16xf32>
    %256 = vector.shape_cast %252 : vector<1x16xf32> to vector<1x1x1x16xf32>
    tpu.vector_store %arg5[%c0_129, %c2_130, %253, %c0_131], %256 {strides = array<i32>} : memref<1x3x8x16xf32, #tpu.memory_space<vmem>>, vector<1x1x1x16xf32>,
    return
  }
  func.func @transform_0(%arg0: i32, %arg1: i32) -> (i32, i32, i32, i32) {
    %c0_i32 = arith.constant 0 : i32
    %c0_i32_0 = arith.constant 0 : i32
    %c0_i32_1 = arith.constant 0 : i32
    return %arg0, %c0_i32, %arg1, %c0_i32_0 : i32, i32, i32, i32
  }
  func.func @transform_1(%arg0: i32, %arg1: i32) -> (i32, i32, i32, i32) {
    %c1_i32 = arith.constant 1 : i32
    %0 = arith.muli %arg1, %c1_i32 : i32
    %c1_i32_0 = arith.constant 1 : i32
    %1 = arith.subi %0, %c1_i32_0 : i32
    %c0_i32 = arith.constant 0 : i32
    %2 = arith.maxsi %1, %c0_i32 : i32
    %c0_i32_1 = arith.constant 0 : i32
    %c0_i32_2 = arith.constant 0 : i32
    %c0_i32_3 = arith.constant 0 : i32
    return %arg0, %c0_i32_1, %2, %c0_i32_2 : i32, i32, i32, i32
  }
  func.func @transform_2(%arg0: i32, %arg1: i32) -> (i32, i32, i32, i32) {
    %c1_i32 = arith.constant 1 : i32
    %0 = arith.addi %arg1, %c1_i32 : i32
    %c1_i32_0 = arith.constant 1 : i32
    %1 = arith.muli %0, %c1_i32_0 : i32
    %c1_i32_1 = arith.constant 1 : i32
    %2 = arith.minsi %1, %c1_i32_1 : i32
    %c0_i32 = arith.constant 0 : i32
    %c0_i32_2 = arith.constant 0 : i32
    %c0_i32_3 = arith.constant 0 : i32
    return %arg0, %c0_i32, %2, %c0_i32_2 : i32, i32, i32, i32
  }
  func.func @transform_3(%arg0: i32, %arg1: i32) -> (i32, i32, i32, i32) {
    %c0_i32 = arith.constant 0 : i32
    %c0_i32_0 = arith.constant 0 : i32
    %c0_i32_1 = arith.constant 0 : i32
    return %arg0, %c0_i32, %arg1, %c0_i32_0 : i32, i32, i32, i32
  }
}

</mosaic_0001>

<bundles_post_ra>
// kernel: tpu_custom_call.1
= control target key start
LH: loop header
LB: loop body
LE: loop exit
PB: predicated region body
PF: predicated region fallthrough
CT: control target
= control target key end

     0   :  { %s2054_s0 = inlined_call_operand.hbm [shape: f32[2,4,16,16], index: 0, kind: input, shape index: {}]   ;;  %s2055_s1 = inlined_call_operand.hbm [shape: f32[2,4,16,16], index: 1, kind: input, shape index: {}]   ;;  %s2056_s2 = inlined_call_operand.hbm [shape: f32[2,4,16,16], index: 2, kind: input, shape index: {}]   ;;  %s2057_s3 = inlined_call_operand.hbm [shape: f32[2,3,16,16], index: 3, kind: output, shape index: {}]  }
   0x1   :  { %2083 = sst [smem:[#allocation23_spill]] %s2054_s0 }
   0x2   :  { %2084 = sst [smem:[#allocation24_spill]] %s2055_s1 }
   0x3   :  { %2085 = sst [smem:[#allocation25_spill]] %s2057_s3 }
   0x4   :  { %8 = vsyncpa [#allocation3], 0 }
   0x5   :  { %10 = vsyncpa [#allocation3 + $0x1], 0 }
   0x6   :  { %11 = vsyncpa [#allocation6], 0 }
   0x7   :  { %13 = vsyncpa [#allocation6 + $0x1], 0 }
   0x8   :  { %14 = vsyncpa [#allocation4], 0 }
   0x9   :  { %16 = vsyncpa [#allocation4 + $0x1], 0  ;;  %s1367_s12 = smov 0   ;;  %s1369_s13 = smov 0  }
   0xa   :  { %s1371_s14 = smov 0   ;;  %s1373_s15 = smov 0  }
   0xb   :  { %s1375_s16 = smov 0   ;;  %s1377_s17 = smov 0  }
   0xc   :  { %s1379_s18 = smov 0   ;;  %s1381_s19 = smov 0  }
   0xd   :  { %s1383_s20 = smov 0   ;;  %s1385_s21 = smov 0  }
   0xe   :  { %s1387_s22 = smov 0   ;;  %s1389_s23 = smov 0  }
   0xf   :  { %s1391_s24 = smov 0   ;;  %s1393_s25 = smov 0  }
  0x10 LB: > { %2086 = sst [smem:[#allocation13_spill]] %s1298_s17  ;;  %s1436_s26 = sadd.s32 4294967295, %s1330_s25   ;;  %s1330_s25 = sphi %s1393_s25, %s22_s25   ;;  %s1326_s24 = sphi %s1391_s24, %s2152_s24   ;;  %s1322_s23 = sphi %s1389_s23, %s2142_s23   ;;  %s1318_s22 = sphi %s1387_s22, %s2151_s22   ;;  %s1314_s21 = sphi %s1385_s21, %s2141_s21   ;;  %s1310_s20 = sphi %s1383_s20, %s2140_s20   ;;  %s1306_s19 = sphi %s1381_s19, %s2150_s19   ;;  %s1302_s18 = sphi %s1379_s18, %s2149_s18   ;;  %s1298_s17 = sphi %s1377_s17, %s2138_s17   ;;  %s1294_s16 = sphi %s1375_s16, %s2148_s16   ;;  %s1290_s15 = sphi %s1373_s15, %s2147_s15   ;;  %s1286_s14 = sphi %s1371_s14, %s2146_s14   ;;  %s1282_s13 = sphi %s1369_s13, %s2145_s13   ;;  %s1278_s12 = sphi %s1367_s12, %s2144_s12  }
  0x11   : > { %2087 = sst [smem:[#allocation14_spill]] %s1302_s18  ;;  %s31_s27 = sadd.s32 1, %s1322_s23 }
  0x12   : > { %2088 = sst [smem:[#allocation15_spill]] %s1310_s20  ;;  %p32_p0 = scmp.ge.s32.totalorder %s31_s27, 2 }
  0x13   : > { %2089 = sst [smem:[#allocation16_spill]] %s1322_s23  ;;  %s34_s28 = sadd.s32 1, %s1326_s24 }
  0x14   : > { %p2066_p1 = scmp.eq.s32.totalorder %s1330_s25, 0  ;;  %p2065_p2 = scmp.eq.s32.totalorder %s1436_s26, 0 }
  0x15   : > { %s2154_s27 = smov (%p32_p0, %s31_s27), 0  ;;  %s2156_s28 = smov (!%p32_p0, %s34_s28), %s1326_s24 }
  0x16   : > { %2090 = sst [smem:[#allocation17_spill]] %s2154_s27  ;;  %s39_s29 = ssub.s32 %s1322_s23, %s2154_s27 }
  0x17   : > { %p36_p3 = scmp.ge.s32.totalorder %s2156_s28, 2  ;;  %s77_s30 = sadd.s32 1, %s1298_s17 }
  0x18   : > { %p84_p4 = scmp.ne.s32.totalorder %s1298_s17, %s1294_s16  ;;  %p90_p6 = scmp.ne.s32.totalorder %s1294_s16, %s1290_s15 }
  0x19   : > { %s2158_s28 = smov (%p36_p3, %s2156_s28), 0  ;;  %p2064_p9 = scmp.lt.s32.totalorder %s1330_s25, 4 }
  0x1a   : > { %2091 = sst [smem:[#allocation18_spill]] %s2158_s28  ;;  %s1452_s4 = ssub.s32 %s1326_s24, %s2158_s28 }
  0x1b   : > { %s1455_s5 = sor.u32 %s39_s29, %s1452_s4  ;;  %p86_p7 = por %p84_p4, %p2066_p1 }
  0x1c   : > { %p1465_p8 = por %p90_p6, %p2065_p2  ;;  %p2063_p10 = scmp.eq.s32.totalorder %s1452_s4, 0 }
  0x1d   : > { %s198_s9 = sand.u32 1, %s1330_s25   ;;  %s200_s10 = sand.u32 1, %s1298_s17  }
  0x1e   : > { %s2092_s6 = scalar_select %p1465_p8, 1, 0 }
  0x1f   : > { %s1475_s8 = scalar_select %p2063_p10, %s1298_s17, %s77_s30  }
  0x20   : > { %s903_s11 = smul.u32 24, %s200_s10  ;;  %s2061_s29 = sshll.u32 %s1326_s24, 10 }
  0x21   : > { %2093 = sst [smem:[#allocation19_spill]] %s1475_s8  ;;  %p1482_p11 = pnand %p2064_p9, %p86_p7 }
  0x22   : > { %s2095_s1 = sld [smem:[#allocation24_spill]]  ;;  %s202_s30 = scalar_lea.vmem [#allocation5], %s903_s11 }
  0x23   : > { %s213_s10 = sshll.u32 %s202_s30, 4  ;;  %s1496_s7 = scalar_lea.sflag [#allocation6], %s198_s9  ;;  %s1493_s10 = int_to_ptr.vmem [resolvable:$true] %s213_s10 }
  0x24   : > { %p1084_p0 = pneg %p1482_p11 }
  0x28   : > { %s1491_s3 = scalar_lea.hbm %s2095_s1, %s2061_s29  ;;  %s1087_s29 = scalar_lea.hbm %s2095_s1, 2048 }
  0x29   : > { %s1082_s8 = scalar_lea.hbm %s1491_s3, 384  ;;  %p1088_p6 = scmp.lt.u32.totalorder %s1491_s3, %s2095_s1 }
  0x2a   : > { %p1083_p13 = scmp.ne.s32.totalorder %s1491_s3, %s1082_s8  ;;  %p1089_p7 = scmp.lt.u32.totalorder %s1087_s29, %s1082_s8 }
  0x2b   : > { %p1091_p9 = scmp.lt.u32.totalorder %s1082_s8, %s1491_s3 }
  0x2c   : > { %p1085_p3 = pnand %p1084_p0, %p1083_p13  ;;  %p1090_p10 = por %p1089_p7, %p1088_p6 }
  0x2e   : > { %p1086_p4 = pneg %p1085_p3  ;;  %p1092_p2 = por %p1091_p9, %p1090_p10 }
  0x30   : > { %p1093_p1 = pnand %p1092_p2, %p1086_p4 }
  0x32   : > { %1096 = shalt.err (!%p1093_p1)
}
  0x33   : > { %s1097_s9 = scalar_lea.vmem %s1493_s10, 384  ;;  %s1332_s30 = smov [#allocation5]  }
  0x34   : > { %p1098_p13 = scmp.ne.s32.totalorder %s1493_s10, %s1097_s9  ;;  %s1102_s27 = sshll.u32 %s1332_s30, 4  ;;  %s1103_s27 = int_to_ptr.vmem [resolvable:$false] %s1102_s27 }
  0x35   : > { %s1104_s17 = scalar_lea.vmem %s1103_s27, 768  ;;  %p1105_p12 = scmp.lt.s32.totalorder %s1493_s10, %s1103_s27 }
  0x36   : > { %p1100_p3 = pnand %p1098_p13, %p1084_p0  ;;  %p1106_p6 = scmp.lt.s32.totalorder %s1104_s17, %s1097_s9 }
  0x38   : > { %p1101_p5 = pneg %p1100_p3  ;;  %p1107_p7 = por %p1106_p6, %p1105_p12 }
  0x3a   : > { %p1108_p9 = pnand %p1107_p7, %p1101_p5 }
  0x3c   : > { %1111 = shalt.err (!%p1108_p9)
}
  0x3d   : > { %s2067_s8 = smov 256   ;;  %s2069_s29 = smov 128  }
  0x3e   : > { %s2071_s28 = smov 8   ;;  %p246_p1 = scmp.lt.s32.totalorder %s1330_s25, 5 }
  0x3f   : > { %923 = dma.hbm_to_vmem [thread:$0]  (!%p1482_p11), %s1491_s3, 384, %s1493_s10, %s1496_s7, %s2067_s8, %s2069_s29, %s2071_s28  }
  0x40   : > { %p2096_p2 = scmp.ge.s32.totalorder %s1330_s25, 1  ;;  %s860_s9 = sadd.s32 4294967294, %s1330_s25  }
  0x41   : > { %s43_s30 = sadd.s32 1, %s1310_s20  ;;  %p2098_p10 = scmp.eq.s32.totalorder %s1455_s5, 0 }
  0x42   : > { %p1530_p5 = pnand %p2096_p2, %p246_p1  ;;  %p50_p12 = scmp.ne.s32.totalorder %s1310_s20, %s1306_s19 }
  0x43   : > { %s1539_s27 = scalar_select %p2098_p10, %s1310_s20, %s43_s30  }
  0x44   : > { %p56_p0 = scmp.ne.s32.totalorder %s1306_s19, %s1302_s18  ;;  %p150_p4 = scmp.eq.s32.totalorder %s1436_s26, 3 }
  0x45   : > { %2099 = sst [smem:[#allocation20_spill]] %s1539_s27  ;;  %p156_p13 = scmp.eq.s32.totalorder %s860_s9, 3 }
  0x46   : > { %p2100_p3 = scmp.eq.s32.totalorder %s1330_s25, 0  ;;  %p2101_p7 = scmp.eq.s32.totalorder %s1436_s26, 0 }
  0x47   : > { %p1554_p9 = por %p150_p4, %p50_p12  ;;  %p1558_p1 = por %p156_p13, %p56_p0 }
  0x48   : > { %p52_p6 = por %p2100_p3, %p50_p12  ;;  %p1550_p11 = por %p2101_p7, %p56_p0 }
  0x49   : > { %s2103_s15 = scalar_select %p1554_p9, 1, 0 }
  0x4a   : > { %s2102_s3 = scalar_select %p1550_p11, 1, 0 }
  0x4b   : > { %2104 = sst [smem:[#allocation21_spill]] %s2103_s15  ;;  %s176_s5 = sand.u32 1, %s1310_s20  }
  0x4c   : > { %s2105_s10 = scalar_select %p1558_p1, 1, 0 }
  0x4d   : > { %s2107_s17 = sshll.u32 %s1326_s24, 3  ;;  %s902_s8 = smul.u32 24, %s176_s5 }
  0x4e   : > { %2106 = sst [smem:[#allocation22_spill]] %s2105_s10  ;;  %s185_s30 = sadd.s32 %s1322_s23, %s2107_s17 }
  0x4f   : > { %s866_s9 = sshll.u32 %s185_s30, 7  ;;  %p2108_p2 = scmp.lt.s32.totalorder %s1330_s25, 4 }
  0x50   : > { %s2110_s0 = sld [smem:[#allocation23_spill]]  ;;  %s180_s20 = scalar_lea.vmem [#allocation2], %s902_s8 }
  0x51   : > { %p1568_p10 = pnand %p2108_p2, %p52_p6  ;;  %s188_s17 = sshll.u32 %s180_s20, 4  ;;  %s1577_s17 = int_to_ptr.vmem [resolvable:$true] %s188_s17 }
  0x52   : > { %s1579_s30 = scalar_lea.sflag [#allocation3], %s176_s5 }
  0x53   : > { %p1114_p0 = pneg %p1568_p10 }
  0x56   : > { %s1575_s27 = scalar_lea.hbm %s2110_s0, %s866_s9  ;;  %s1117_s9 = scalar_lea.hbm %s2110_s0, 2048 }
  0x57   : > { %s1112_s23 = scalar_lea.hbm %s1575_s27, 384  ;;  %p1118_p3 = scmp.lt.u32.totalorder %s1575_s27, %s2110_s0 }
  0x58   : > { %p1113_p12 = scmp.ne.s32.totalorder %s1575_s27, %s1112_s23  ;;  %p1119_p6 = scmp.lt.u32.totalorder %s1117_s9, %s1112_s23 }
  0x59   : > { %p1121_p2 = scmp.lt.u32.totalorder %s1112_s23, %s1575_s27 }
  0x5a   : > { %p1115_p4 = pnand %p1114_p0, %p1113_p12  ;;  %p1120_p7 = por %p1119_p6, %p1118_p3 }
  0x5c   : > { %p1116_p13 = pneg %p1115_p4  ;;  %p1122_p1 = por %p1121_p2, %p1120_p7 }
  0x5e   : > { %p1123_p9 = pnand %p1122_p1, %p1116_p13 }
  0x60   : > { %1126 = shalt.err (!%p1123_p9)
}
  0x61   : > { %s1127_s20 = scalar_lea.vmem %s1577_s17, 384  ;;  %s1336_s8 = smov [#allocation2]  }
  0x62   : > { %p1128_p12 = scmp.ne.s32.totalorder %s1577_s17, %s1127_s20  ;;  %s1132_s5 = sshll.u32 %s1336_s8, 4  ;;  %s1133_s5 = int_to_ptr.vmem [resolvable:$false] %s1132_s5 }
  0x63   : > { %s1134_s18 = scalar_lea.vmem %s1133_s5, 768  ;;  %p1135_p11 = scmp.lt.s32.totalorder %s1577_s17, %s1133_s5 }
  0x64   : > { %p1130_p4 = pnand %p1128_p12, %p1114_p0  ;;  %p1136_p3 = scmp.lt.s32.totalorder %s1134_s18, %s1127_s20 }
  0x66   : > { %p1131_p8 = pneg %p1130_p4  ;;  %p1137_p6 = por %p1136_p3, %p1135_p11 }
  0x68   : > { %p1138_p7 = pnand %p1137_p6, %p1131_p8 }
  0x6a   : > { %1141 = shalt.err (!%p1138_p7)
}
  0x6b   : > { %s2111_s23 = smov 8   ;;  %s2112_s10 = smov 128  }
  0x6c   : > { %s2113_s1 = smov 256   ;;  %s111_s29 = sadd.s32 1, %s1286_s14 }
  0x6d   : > { %920 = dma.hbm_to_vmem [thread:$0]  (!%p1568_p10), %s1575_s27, 384, %s1577_s17, %s1579_s30, %s2113_s1, %s2112_s10, %s2111_s23  }
  0x6e   : > { %p118_p8 = scmp.ne.s32.totalorder %s1286_s14, %s1282_s13  ;;  %p124_p11 = scmp.ne.s32.totalorder %s1282_s13, %s1278_s12 }
  0x6f   : > { %s225_s28 = sand.u32 1, %s1286_s14   ;;  %p2114_p9 = scmp.eq.s32.totalorder %s1330_s25, 0 }
  0x70   : > { %p2115_p0 = scmp.eq.s32.totalorder %s1436_s26, 0  ;;  %s904_s20 = smul.u32 24, %s225_s28 }
  0x71   : > { %p120_p1 = por %p118_p8, %p2114_p9  ;;  %s2117_s8 = sshll.u32 %s1326_s24, 10 }
  0x72   : > { %p1620_p13 = por %p124_p11, %p2115_p0  ;;  %s1274_s5 = sadd.s32 128, %s2117_s8 }
  0x73   : > { %s227_s18 = scalar_lea.vmem [#allocation7], %s904_s20  ;;  %p2118_p2 = scmp.eq.s32.totalorder %s1452_s4, 0 }
  0x74   : > { %s2116_s9 = scalar_select %p1620_p13, 1, 0 }
  0x75   : > { %s238_s0 = sshll.u32 %s227_s18, 4  ;;  %s1634_s12 = scalar_lea.hbm %s2056_s2, %s1274_s5  ;;  %s1636_s0 = int_to_ptr.vmem [resolvable:$true] %s238_s0 }
  0x76   : > { %s1629_s15 = scalar_select %p2118_p2, %s1286_s14, %s111_s29  }
  0x77   : > { %p2119_p10 = scmp.lt.s32.totalorder %s1330_s25, 4  ;;  %s1142_s4 = scalar_lea.hbm %s1634_s12, 384 }
  0x78   : > { %p1143_p4 = scmp.ne.s32.totalorder %s1634_s12, %s1142_s4  ;;  %s1147_s20 = scalar_lea.hbm %s2056_s2, 2048 }
  0x79   : > { %p1640_p12 = pnand %p2119_p10, %p120_p1  ;;  %p1148_p8 = scmp.lt.u32.totalorder %s1634_s12, %s2056_s2 }
  0x7a   : > { %p1149_p11 = scmp.lt.u32.totalorder %s1147_s20, %s1142_s4  ;;  %p1151_p1 = scmp.lt.u32.totalorder %s1142_s4, %s1634_s12 }
  0x7b   : > { %p1144_p3 = pneg %p1640_p12 }
  0x7c   : > { %p1150_p9 = por %p1149_p11, %p1148_p8 }
  0x7d   : > { %p1145_p6 = pnand %p1144_p3, %p1143_p4 }
  0x7e   : > { %p1152_p0 = por %p1151_p1, %p1150_p9 }
  0x7f   : > { %p1146_p7 = pneg %p1145_p6 }
  0x81   : > { %p1153_p2 = pnand %p1152_p0, %p1146_p7 }
  0x83   : > { %1156 = shalt.err (!%p1153_p2)
}
  0x84   : > { %s1157_s18 = scalar_lea.vmem %s1636_s0, 384  ;;  %s1337_s27 = smov [#allocation7]  }
  0x85   : > { %p1158_p10 = scmp.ne.s32.totalorder %s1636_s0, %s1157_s18  ;;  %s1162_s17 = sshll.u32 %s1337_s27, 4  ;;  %s1163_s17 = int_to_ptr.vmem [resolvable:$false] %s1162_s17 }
  0x86   : > { %s1164_s29 = scalar_lea.vmem %s1163_s17, 768  ;;  %p1165_p13 = scmp.lt.s32.totalorder %s1636_s0, %s1163_s17 }
  0x87   : > { %p1160_p4 = pnand %p1158_p10, %p1144_p3  ;;  %p1166_p8 = scmp.lt.s32.totalorder %s1164_s29, %s1157_s18 }
  0x89   : > { %p1161_p6 = pneg %p1160_p4  ;;  %p1167_p11 = por %p1166_p8, %p1165_p13 }
  0x8b   : > { %p1168_p9 = pnand %p1167_p11, %p1161_p6 }
  0x8d   : > { %1171 = shalt.err (!%p1168_p9)
}
  0x8e   : > { %926 = dma.hbm_to_vmem [thread:$0]  (!%p1640_p12), %s1634_s12, 384, %s1636_s0, %s1496_s7, %s2113_s1, %s2112_s10, %s2111_s23  }
  0x8f   : > { %250 = sbr.rel (%p1530_p5) target bundleno = 686 (0x2ae), region = 32  ;;  %s1676_s4 = sand.u32 (!%p1530_p5), 1, %s1306_s19  }
  0x90   : > { %s905_s28 = smul.u32 (!%p1530_p5), 24, %s1676_s4  ;;  %s253_s20 = scalar_lea.sflag (!%p1530_p5), [#allocation3], %s1676_s4 }
  0x91   : > { %p2121_p13 = scmp.ne.s32.totalorder (!%p1530_p5), %s2102_s3, 0 }
  0x92   : > { %s1682_s30 = scalar_lea.vmem (!%p1530_p5), [#allocation2], %s905_s28 }
  0x96   : > { %1257 = dma.done.wait (%p2121_p13), %s253_s20, 384  }
  0x97   : > { %1259 = vsyncadd (%p2121_p13), %s253_s20, 4294966912  ;;  %s261_s0 = sand.u32 1, %s1436_s26   ;;  %s263_s7 = sand.u32 1, %s1294_s16  }
  0x98   : > { %s906_s11 = smul.u32 24, %s263_s7  ;;  %s262_s23 = scalar_lea.sflag [#allocation6], %s261_s0 }
  0x99   : > { %p2122_p5 = scmp.ne.s32.totalorder %s2092_s6, 0 }
  0x9a   : > { %s1690_s10 = scalar_lea.vmem [#allocation5], %s906_s11 }
  0x9b   : > { %1261 = dma.done.wait (%p2122_p5), %s262_s23, 384  }
  0x9c   : > { %1263 = vsyncadd (%p2122_p5), %s262_s23, 4294966912  ;;  %s272_s1 = sand.u32 1, %s1282_s13   ;;  %p2123_p12 = scmp.ne.s32.totalorder %s2116_s9, 0 }
  0x9d   : > { %s907_s12 = smul.u32 24, %s272_s1 }
  0x9f   : > { %s1697_s3 = scalar_lea.vmem [#allocation7], %s907_s12 }
  0xa0   : > { %1265 = dma.done.wait (%p2123_p12), %s262_s23, 384  }
  0xa1   : > { %1267 = vsyncadd (%p2123_p12), %s262_s23, 4294966912  ;;  %s873_s26 = sshll.u32 %s1314_s21, 3  ;;  %v1711_v0 = vld [vmem:[%s1682_s30] sm:$0xff]  ;;  %v1714_v1 = vld [vmem:[%s1682_s30 + $0x8] sm:$0xff]  ;;  %s1338_s5 = smov 16   ;;  %vm337_vm0 = vcmask 1047680   ;;  %v320_v62 = vlaneseq }
  0xa2   : > { %s1704_s8 = ssub.s32 16, %s873_s26  ;;  %338 = vrot.lane.b32.xlu0 %v1711_v0, %s1338_s5  ;;  %464 = vrot.lane.b32.xlu1 %v1714_v1, %s1338_s5  ;;  %v1734_v4 = vld [vmem:[%s1682_s30 + $0x10] sm:$0xff]  ;;  %v1339_v10 = vmov 14   ;;  %v1340_v15 = vmov 1   ;;  %s1341_s27 = smov 114   ;;  %v359_v32 = vsub.f32 0.0, %v1711_v0 }
  0xa3   : > { %p315_p3 = scmp.lt.s32.totalorder %s1704_s8, 8  ;;  %1057 = vset.pattern.permute.xlu1 %v1339_v10  ;;  %1056 = vset.pattern.permute.xlu0 %v1340_v15  ;;  %v485_v33 = vsub.f32 0.0, %v1714_v1  ;;  %v604_v34 = vsub.f32 0.0, %v1734_v4  ;;  %s1342_s17 = smov 127   ;;  %v327_v59 = vld [vmem:[%s1690_s10 + $0x7] sm:$0x1] }
  0xa4   : > { %p324_p1 = scmp.eq.s32.totalorder %s1314_s21, 0  ;;  %p325_p0 = scmp.eq.s32.totalorder %s1314_s21, 1  ;;  %vm380_vm6 = vcmask 130048   ;;  %vm399_vm8 = vcmask 123905   ;;  %vm454_vm13 = vcmask 122880  }
  0xa5   : > { %s1708_s6 = scalar_select %p315_p3, %s1704_s8, 8 }
  0xa6   : > { %s328_s29 = scalar_select %p324_p1, 1, 0 }
  0xa7   : > { %s874_s9 = sadd.s32 4294967295, %s1708_s6  ;;  %s875_s20 = sadd.s32 4294967294, %s1708_s6 }
  0xa8   : > { %p318_p7 = scmp.gt.s32.totalorder %s874_s9, 0  ;;  %v329_v57 = vstv %s328_s29  ;;  %p404_p2 = scmp.gt.s32.totalorder %s875_s20, 0 }
  0xa9   : > { %p876_p10 = scmp.ge.s32.totalorder %s1704_s8, 2  ;;  %vm1799_vm1 = vcmp.eq.s32.totalorder %v329_v57, 1  ;;  %s908_s23 = smul.u32 6, %s1318_s22 }
  0xaa   : > { %s2160_s9 = smov (!%p318_p7, %s874_s9), 0  ;;  %s2162_s20 = smov (!%p404_p2, %s875_s20), 0 }
  0xab   : > { %s401_s18 = scalar_lea.vmem %s1682_s30, %s2160_s9 [#allocation2]  ;;  %s1819_s11 = scalar_lea.vmem %s1682_s30, %s2162_s20 [#allocation2] }
  0xac   : > { %v1725_v2 = vld [vmem:[%s401_s18] sm:$0x1]  ;;  %v1727_v3 = vld [vmem:[%s401_s18 + $0x8] sm:$0x1]  ;;  %v1736_v5 = vld [vmem:[%s401_s18 + $0x10] sm:$0x1]  ;;  %s706_s22 = sadd.s32 %s1314_s21, %s908_s23 }
  0xad   : > { %413 = vrot.lane.b32.xlu0 %v1725_v2, %s1338_s5  ;;  %533 = vrot.lane.b32.xlu1 %v1727_v3, %s1338_s5  ;;  %v434_v35 = vsub.f32 0.0, %v1725_v2  ;;  %v673_v36 = vsub.f32 0.0, %v1736_v5  ;;  %v554_v37 = vsub.f32 0.0, %v1727_v3  ;;  %s333_s0 = scalar_select %p325_p0, 1, 0 }
  0xae   : > { %s901_s7 = scalar_select %p876_p10, 1, 0 }
  0xaf   : > { %s1914_s30 = scalar_lea.vmem [#allocation8], %s905_s28  ;;  %s897_s1 = sshll.u32 %s706_s22, 7 }
  0xb0   : > { %s1934_s28 = scalar_lea.vmem %s1914_s30, %s2160_s9 [#allocation8]  ;;  %s2130_s21 = sld [smem:[#allocation21_spill]] }
  0xb1   : > { %583 = vrot.lane.b32.xlu0 %v1734_v4, %s1338_s5  ;;  %652 = vrot.lane.b32.xlu1 %v1736_v5, %s1338_s5  ;;  %s2131_s26 = sld [smem:[#allocation25_spill]]  ;;  %s695_s6 = scalar_lea.sflag [#allocation4], %s1676_s4 }
  0xb6   : > { %p2132_p6 = scmp.ne.s32.totalorder %s2130_s21, 0 }
  0xb7   : > { %s1974_s8 = scalar_lea.hbm %s2131_s26, %s897_s1 }
 0x114   : > { %v339_v6 = vpop.permute.xlu0 %338  ;;  %v465_v7 = vpop.permute.xlu1 %464 }
 0x115   : > { %v340_v8 = vsel %vm337_vm0, %v339_v6, %v1711_v0  ;;  %v466_v9 = vsel %vm337_vm0, %v465_v7, %v1714_v1  ;;  %v1811_v6 = vand.u32 127, %v320_v62  ;;  %v882_v7 = vld [vmem:[%s1690_s10 + $0xf] sm:$0x1] }
 0x116   : > { %341 = vrot.lane.b32.xlu0 %v340_v8, %s1338_s5 }
 0x117   : > { %vm322_vm2 = vcmp.eq.s32.totalorder %v1811_v6, 0  ;;  %vm323_vm3 = vcmp.eq.s32.totalorder %v1811_v6, 15 }
 0x11a   : > { %467 = vrot.lane.b32.xlu0 %v466_v9, %s1338_s5 }
 0x11f   : > { %v414_v11 = vpop.permute.xlu0 %413  ;;  %v534_v12 = vpop.permute.xlu1 %533 }
 0x120   : > { %v415_v13 = vsel %vm337_vm0, %v414_v11, %v1725_v2  ;;  %v535_v14 = vsel %vm337_vm0, %v534_v12, %v1727_v3  ;;  %v493_v11 = vrot.slane %v1714_v1, 7  ;;  %v334_v12 = vstv %s333_s0 }
 0x121   : > { %416 = vrot.lane.b32.xlu1 %v415_v13, %s1338_s5  ;;  %v410_v13 = vstv %s901_s7  ;;  %vm1829_vm4 = vcmp.eq.s32.totalorder %v334_v12, 1  ;;  %v891_v12 = vld [vmem:[%s1697_s3 + $0x10] sm:$0x1] }
 0x122   : > { %vm1834_vm5 = vcmp.eq.s32.totalorder %v410_v13, 1  ;;  %v895_v13 = vld [vmem:[%s1819_s11 + $0x10] sm:$0x1] }
 0x123   : > { %v584_v16 = vpop.permute.xlu0 %583  ;;  %v653_v17 = vpop.permute.xlu1 %652 }
 0x124   : > { %v585_v18 = vsel %vm337_vm0, %v584_v16, %v1734_v4  ;;  %v654_v19 = vsel %vm337_vm0, %v653_v17, %v1736_v5 }
 0x125   : > { %536 = vrot.lane.b32.xlu1 %v535_v14, %s1338_s5  ;;  %586 = vrot.lane.b32.xlu0 %v585_v18, %s1338_s5  ;;  %v332_v18 = vld [vmem:[%s1697_s3] sm:$0x1] }
 0x129   : > { %655 = vrot.lane.b32.xlu1 %v654_v19, %s1338_s5  ;;  %s1343_s5 = smov [#allocation8]  }
 0x12a   : > { %s1176_s18 = sshll.u32 %s1343_s5, 4  ;;  %s1177_s18 = int_to_ptr.vmem [resolvable:$false] %s1176_s18 }
 0x188   : > { %v342_v20 = vpop.permute.xlu0 %341 }
 0x189   : > { %v343_v21 = vsel %vm337_vm0, %v342_v20, %v1711_v0  ;;  %v407_v20 = vld [vmem:[%s1819_s11] sm:$0x1] }
 0x18a   : > { %345 = vrot.lane.b32.xlu0 %v343_v21, %s1341_s27 }
 0x18c   : > { %v468_v22 = vpop.permute.xlu0 %467 }
 0x18d   : > { %v469_v23 = vsel %vm337_vm0, %v468_v22, %v1714_v1 }
 0x18e   : > { %471 = vrot.lane.b32.xlu0 %v469_v23, %s1341_s27 }
 0x193   : > { %v417_v24 = vpop.permute.xlu1 %416 }
 0x194   : > { %v418_v25 = vsel %vm337_vm0, %v417_v24, %v1725_v2 }
 0x195   : > { %420 = vrot.lane.b32.xlu1 %v418_v25, %s1341_s27 }
 0x197   : > { %v537_v26 = vpop.permute.xlu1 %536  ;;  %v587_v27 = vpop.permute.xlu0 %586 }
 0x198   : > { %v538_v28 = vsel %vm337_vm0, %v537_v26, %v1727_v3  ;;  %v588_v29 = vsel %vm337_vm0, %v587_v27, %v1734_v4 }
 0x199   : > { %540 = vrot.lane.b32.xlu1 %v538_v28, %s1341_s27  ;;  %590 = vrot.lane.b32.xlu0 %v588_v29, %s1341_s27 }
 0x19b   : > { %v656_v30 = vpop.permute.xlu1 %655 }
 0x19c   : > { %v657_v31 = vsel %vm337_vm0, %v656_v30, %v1736_v5 }
 0x19d   : > { %659 = vrot.lane.b32.xlu1 %v657_v31, %s1341_s27  ;;  %351 = vperm.xlu0 %1056, %v1711_v0   ;;  %s1178_s27 = scalar_lea.vmem %s1177_s18, 768 }
 0x1a1   : > { %362 = vperm.xlu1 %1057, %v359_v32   ;;  %477 = vperm.xlu0 %1056, %v1714_v1  }
 0x1a5   : > { %1058 = vset.pattern.permute.xlu1 %v1340_v15  ;;  %1060 = vset.pattern.permute.xlu0 %v1339_v10 }
 0x1a6   : > { %426 = vperm.xlu1 %1058, %v1725_v2   ;;  %488 = vperm.xlu0 %1060, %v485_v33   ;;  %v331_v2 = vsel %vm1799_vm1, 0.0, %v327_v59  ;;  %v883_v33 = vld [vmem:[%s1697_s3 + $0x8] sm:$0x1] }
 0x1a7   : > { %v383_v8 = vrot.slane %v331_v2, 7 }
 0x1a9   : > { %v385_v17 = vsub.f32 %v1711_v0, %v383_v8 }
 0x1aa   : > { %1059 = vset.pattern.permute.xlu1 %v1339_v10  ;;  %607 = vperm.xlu0 %1060, %v604_v34   ;;  %v887_v34 = vld [vmem:[%s1819_s11 + $0x8] sm:$0x1] }
 0x1ab   : > { %437 = vperm.xlu1 %1059, %v434_v35  }
 0x1ae   : > { %676 = vperm.xlu0 %1060, %v673_v36  }
 0x1af   : > { %1061 = vset.pattern.permute.xlu1 %v1340_v15 }
 0x1b0   : > { %546 = vperm.xlu1 %1061, %v1727_v3   ;;  %v366_v3 = vrot.slane %v1711_v0, 1 }
 0x1b4   : > { %596 = vperm.xlu1 %1061, %v1734_v4  }
 0x1b8   : > { %1062 = vset.pattern.permute.xlu1 %v1339_v10  ;;  %v492_v10 = vrot.slane %v1714_v1, 1 }
 0x1b9   : > { %557 = vperm.xlu1 %1062, %v554_v37  }
 0x1bd   : > { %1063 = vset.pattern.permute.xlu1 %v1340_v15  ;;  %v460_v15 = vsel %vm1799_vm1, 0.0, %v882_v7 }
 0x1be   : > { %665 = vperm.xlu1 %1063, %v1736_v5   ;;  %v367_v5 = vrot.slane %v1711_v0, 7  ;;  %v509_v24 = vrot.slane %v460_v15, 7 }
 0x1c0   : > { %v368_v14 = vsub.f32 %v366_v3, %v367_v5  ;;  %v511_v36 = vsub.f32 %v1714_v1, %v509_v24  ;;  %v463_v1 = vsel %vm1829_vm4, 0.0, %v883_v33 }
 0x1c2   : > { %v369_v0 = vmul.f32 %v368_v14, %v368_v14  ;;  %v512_v57 = vmul.f32 %v511_v36, %v511_v36 }
 0x1fc   : > { %v346_v38 = vpop.permute.xlu0 %345 }
 0x1fd   : > { %v348_v39 = vsub.f32 %v343_v21, %v346_v38  ;;  %v611_v38 = vrot.slane %v1734_v4, 1 }
 0x1ff   : > { %355 = vrot.lane.b32.xlu0 %v348_v39, %s1342_s17  ;;  %v612_v39 = vrot.slane %v1734_v4, 7 }
 0x200   : > { %v472_v40 = vpop.permute.xlu0 %471 }
 0x201   : > { %v474_v41 = vsub.f32 %v469_v23, %v472_v40  ;;  %v494_v23 = vsub.f32 %v492_v10, %v493_v11 }
 0x203   : > { %481 = vrot.lane.b32.xlu1 %v474_v41, %s1342_s17  ;;  %v495_v35 = vmul.f32 %v494_v23, %v494_v23 }
 0x207   : > { %v421_v42 = vpop.permute.xlu1 %420 }
 0x208   : > { %v423_v43 = vsub.f32 %v418_v25, %v421_v42  ;;  %v890_v25 = vld [vmem:[%s1690_s10 + $0x17] sm:$0x1]  ;;  %s709_s10 = sshll.u32 %s1914_s30, 4  ;;  %s1965_s10 = int_to_ptr.vmem [resolvable:$true] %s709_s10 }
 0x209   : > { %v579_v32 = vsel %vm1799_vm1, 0.0, %v890_v25  ;;  %s1172_s9 = scalar_lea.vmem %s1965_s10, 384  ;;  %p1179_p9 = scmp.lt.s32.totalorder %s1965_s10, %s1177_s18 }
 0x20a   : > { %430 = vrot.lane.b32.xlu0 %v423_v43, %s1342_s17  ;;  %v651_v23 = vsel %vm1834_vm5, %v895_v13, %v579_v32  ;;  %p1173_p4 = scmp.ne.s32.totalorder %s1965_s10, %s1172_s9  ;;  %p1180_p13 = scmp.lt.s32.totalorder %s1178_s27, %s1172_s9 }
 0x20b   : > { %v541_v44 = vpop.permute.xlu1 %540  ;;  %v591_v45 = vpop.permute.xlu0 %590 }
 0x20c   : > { %v543_v46 = vsub.f32 %v538_v28, %v541_v44  ;;  %v593_v47 = vsub.f32 %v588_v29, %v591_v45  ;;  %v336_v28 = vsel %vm1829_vm4, 0.0, %v332_v18  ;;  %v412_v29 = vsel %vm1834_vm5, %v407_v20, %v331_v2  ;;  %p1174_p8 = pnand %p1173_p4, %p2132_p6  ;;  %p1181_p5 = por %p1180_p13, %p1179_p9 }
 0x20d   : > { %v441_v43 = vsub.f32 %v336_v28, %v412_v29 }
 0x20e   : > { %600 = vrot.lane.b32.xlu0 %v593_v47, %s1342_s17  ;;  %550 = vrot.lane.b32.xlu1 %v543_v46, %s1342_s17  ;;  %v628_v46 = vrot.slane %v579_v32, 7  ;;  %v532_v47 = vsel %vm1834_vm5, %v887_v34, %v460_v15  ;;  %p1175_p11 = pneg %p1174_p8 }
 0x20f   : > { %v660_v48 = vpop.permute.xlu1 %659  ;;  %v442_v59 = vmul.f32 %v441_v43, %v441_v43  ;;  %v561_v60 = vsub.f32 %v463_v1, %v532_v47 }
 0x210   : > { %v662_v49 = vsub.f32 %v657_v31, %v660_v48  ;;  %v386_v31 = vmul.f32 %v385_v17, %v385_v17  ;;  %p1182_p12 = pnand %p1181_p5, %p1175_p11 }
 0x211   : > { %v562_v20 = vmul.f32 %v561_v60, %v561_v60 }
 0x212   : > { %669 = vrot.lane.b32.xlu1 %v662_v49, %s1342_s17 }
 0x21c   : > { %v352_v52 = vpop.permute.xlu0 %351 }
 0x220   : > { %v363_v50 = vpop.permute.xlu1 %362  ;;  %v1788_v54 = vpop.permute.xlu0 %477 }
 0x225   : > { %v1784_v51 = vpop.permute.xlu1 %426  ;;  %v489_v56 = vpop.permute.xlu0 %488 }
 0x229   : > { %v1803_v61 = vpop.permute.xlu0 %607 }
 0x22a   : > { %v1786_v53 = vpop.permute.xlu1 %437 }
 0x22d   : > { %v1814_v9 = vpop.permute.xlu0 %676 }
 0x22f   : > { %v1791_v55 = vpop.permute.xlu1 %546 }
 0x233   : > { %v1795_v58 = vpop.permute.xlu1 %596 }
 0x238   : > { %v1805_v63 = vpop.permute.xlu1 %557 }
 0x23d   : > { %v1825_v16 = vpop.permute.xlu1 %665 }
 0x271   : > { %v356_v22 = vpop.permute.xlu0 %355 }
 0x272   : > { %v358_v26 = vsel %vm322_vm2, %v352_v52, %v356_v22  ;;  %v582_v22 = vsel %vm1829_vm4, 0.0, %v891_v12 }
 0x273   : > { %v365_v27 = vsel %vm323_vm3, %v363_v50, %v358_v26  ;;  %v680_v19 = vsub.f32 %v582_v22, %v651_v23 }
 0x274   : > { %v370_v30 = vmul.f32 %v365_v27, %v365_v27 }
 0x275   : > { %v482_v37 = vpop.permute.xlu1 %481 }
 0x276   : > { %v371_v40 = vadd.f32 %v370_v30, %v369_v0  ;;  %v388_v41 = vrot.slane %v370_v30, 7  ;;  %v484_v42 = vsel %vm322_vm2, %v1788_v54, %v482_v37 }
 0x277   : > { %v491_v44 = vsel %vm323_vm3, %v489_v56, %v484_v42  ;;  %v613_v56 = vsub.f32 %v611_v38, %v612_v39  ;;  %v681_v38 = vmul.f32 %v680_v19, %v680_v19 }
 0x278   : > { %v372_v48 = vadd.f32 1e-06, %v371_v40  ;;  %v390_v49 = vadd.f32 %v388_v41, %v386_v31  ;;  %v496_v50 = vmul.f32 %v491_v44, %v491_v44 }
 0x279   : > { %v614_v11 = vmul.f32 %v613_v56, %v613_v56 }
 0x27a   : > { %1064 = vrsqrt.f32 %v372_v48  ;;  %v1869_v62 = vadd.f32 1e-06, %v390_v49  ;;  %v497_v2 = vadd.f32 %v496_v50, %v495_v35  ;;  %v514_v3 = vrot.slane %v496_v50, 7 }
 0x27b   : > { %vm375_vm7 = vcmp.eq.f32.partialorder %v372_v48, inf  ;;  %v378_v32 = vand.u32 2147483648, %v372_v48  ;;  %vm377_vm9 = vcmp.eq.f32.partialorder %v372_v48, 0.0 }
 0x27c   : > { %v431_v45 = vpop.permute.xlu0 %430  ;;  %1066 = vrsqrt.f32 %v1869_v62  ;;  %v1881_v14 = vadd.f32 1e-06, %v497_v2  ;;  %v516_v15 = vadd.f32 %v514_v3, %v512_v57  ;;  %vm394_vm10 = vcmp.eq.f32.partialorder %v1869_v62, inf }
 0x27d   : > { %v433_v52 = vsel %vm322_vm2, %v1784_v51, %v431_v45  ;;  %v630_v51 = vsub.f32 %v1734_v4, %v628_v46  ;;  %v397_v6 = vand.u32 2147483648, %v1869_v62  ;;  %vm396_vm11 = vcmp.eq.f32.partialorder %v1869_v62, 0.0 }
 0x27e   : > { %v440_v54 = vsel %vm323_vm3, %v1786_v53, %v433_v52  ;;  %1068 = vrsqrt.f32 %v1881_v14  ;;  %v1894_v25 = vadd.f32 1e-06, %v516_v15  ;;  %vm501_vm12 = vcmp.eq.f32.partialorder %v1881_v14, inf }
 0x27f   : > { %v443_v5 = vmul.f32 %v440_v54, %v440_v54  ;;  %v504_v57 = vand.u32 2147483648, %v1881_v14 }
 0x280   : > { %v601_v7 = vpop.permute.xlu0 %600  ;;  %v551_v8 = vpop.permute.xlu1 %550  ;;  %1070 = vrsqrt.f32 %v1894_v25  ;;  %vm520_vm14 = vcmp.eq.f32.partialorder %v1894_v25, inf  ;;  %vm522_vm0 = vcmp.eq.f32.partialorder %v1894_v25, 0.0 }
 0x281   : > { %v603_v53 = vsel %vm322_vm2, %v1795_v58, %v601_v7  ;;  %v553_v10 = vsel %vm322_vm2, %v1791_v55, %v551_v8  ;;  %v444_v17 = vadd.f32 %v443_v5, %v442_v59  ;;  %v631_v55 = vmul.f32 %v630_v51, %v630_v51 }
 0x282   : > { %v610_v4 = vsel %vm323_vm3, %v1803_v61, %v603_v53  ;;  %v560_v58 = vsel %vm323_vm3, %v1805_v63, %v553_v10 }
 0x283   : > { %v615_v18 = vmul.f32 %v610_v4, %v610_v4  ;;  %v1896_v26 = vadd.f32 1e-06, %v444_v17  ;;  %v563_v27 = vmul.f32 %v560_v58, %v560_v58 }
 0x284   : > { %v670_v24 = vpop.permute.xlu1 %669  ;;  %v1065_v28 = vpop.eup %1064 }
 0x285   : > { %v616_v61 = vadd.f32 %v615_v18, %v614_v11  ;;  %v633_v0 = vrot.slane %v615_v18, 7  ;;  %v672_v63 = vsel %vm322_vm2, %v1825_v16, %v670_v24  ;;  %1072 = vrsqrt.f32 %v1896_v26 }
 0x286   : > { %v374_v21 = vmul.f32 %v1065_v28, %v372_v48  ;;  %v564_v31 = vadd.f32 %v563_v27, %v562_v20  ;;  %v679_v33 = vsel %vm323_vm3, %v1814_v9, %v672_v63  ;;  %v1067_v34 = vpop.eup %1066  ;;  %vm448_vm15 = vcmp.eq.f32.partialorder %v1896_v26, inf }
 0x287   : > { %v1903_v29 = vadd.f32 1e-06, %v616_v61  ;;  %v635_v30 = vadd.f32 %v633_v0, %v631_v55  ;;  %v393_v36 = vmul.f32 %v1067_v34, %v1869_v62  ;;  %v682_v39 = vmul.f32 %v679_v33, %v679_v33 }
 0x288   : > { %v376_v16 = vsel %vm375_vm7, %v372_v48, %v374_v21  ;;  %v565_v9 = vadd.f32 1e-06, %v564_v31  ;;  %v1069_v40 = vpop.eup %1068  ;;  %v523_v48 = vand.u32 2147483648, %v1894_v25  ;;  %v451_v54 = vand.u32 2147483648, %v1896_v26 }
 0x289   : > { %1074 = vrsqrt.f32 %v1903_v29  ;;  %v379_v35 = vsel %vm377_vm9, %v378_v32, %v376_v16  ;;  %v1910_v37 = vadd.f32 1e-06, %v635_v30  ;;  %v395_v41 = vsel %vm394_vm10, %v1869_v62, %v393_v36 }
 0x28a   : > { %381 = vst.msk [vmem:[%s1914_s30] sm:$0xff] %vm380_vm6, %v379_v35  ;;  %v398_v42 = vsel %vm396_vm11, %v397_v6, %v395_v41  ;;  %v500_v43 = vmul.f32 %v1069_v40, %v1881_v14  ;;  %v683_v44 = vadd.f32 %v682_v39, %v681_v38  ;;  %v1071_v45 = vpop.eup %1070  ;;  %vm450_vm1 = vcmp.eq.f32.partialorder %v1896_v26, 0.0 }
 0x28b   : > { %1076 = vrsqrt.f32 %v1910_v37  ;;  %400 = vst.msk [vmem:[%s1914_s30 - $0x1] sm:$0x2] %vm399_vm8, %v398_v42  ;;  %v519_v1 = vmul.f32 %v1071_v45, %v1894_v25  ;;  %vm503_vm2 = vcmp.eq.f32.partialorder %v1881_v14, 0.0  ;;  %vm620_vm3 = vcmp.eq.f32.partialorder %v1903_v29, inf }
 0x28c   : > { %1078 = vrsqrt.f32 %v565_v9  ;;  %v684_v47 = vadd.f32 1e-06, %v683_v44  ;;  %v502_v50 = vsel %vm501_vm12, %v1881_v14, %v500_v43  ;;  %vm622_vm4 = vcmp.eq.f32.partialorder %v1903_v29, 0.0 }
 0x28d   : > { %v521_v52 = vsel %vm520_vm14, %v1894_v25, %v519_v1  ;;  %v505_v3 = vsel %vm503_vm2, %v504_v57, %v502_v50  ;;  %v623_v53 = vand.u32 2147483648, %v1903_v29  ;;  %vm639_vm5 = vcmp.eq.f32.partialorder %v1910_v37, inf }
 0x28e   : > { %1080 = vrsqrt.f32 %v684_v47  ;;  %v524_v60 = vsel %vm522_vm0, %v523_v48, %v521_v52  ;;  %v642_v12 = vand.u32 2147483648, %v1910_v37  ;;  %vm568_vm7 = vcmp.eq.f32.partialorder %v565_v9, inf }
 0x28f   : > { %v1073_v46 = vpop.eup %1072  ;;  %v571_v13 = vand.u32 2147483648, %v565_v9  ;;  %vm641_vm9 = vcmp.eq.f32.partialorder %v1910_v37, 0.0  ;;  %vm570_vm10 = vcmp.eq.f32.partialorder %v565_v9, 0.0  ;;  %vm687_vm11 = vcmp.eq.f32.partialorder %v684_v47, inf }
 0x290   : > { %v447_v49 = vmul.f32 %v1073_v46, %v1896_v26  ;;  %v690_v58 = vand.u32 2147483648, %v684_v47  ;;  %vm689_vm12 = vcmp.eq.f32.partialorder %v684_v47, 0.0 }
 0x292   : > { %v449_v59 = vsel %vm448_vm15, %v1896_v26, %v447_v49 }
 0x293   : > { %v1075_v56 = vpop.eup %1074  ;;  %v452_v62 = vsel %vm450_vm1, %v451_v54, %v449_v59 }
 0x294   : > { %v619_v2 = vmul.f32 %v1075_v56, %v1903_v29  ;;  %455 = vst.msk [vmem:[%s1934_s28] sm:$0x1] %vm454_vm13, %v452_v62 }
 0x295   : > { %v1077_v5 = vpop.eup %1076  ;;  %884 = vst.msk [vmem:[%s1914_s30 + $0x8] sm:$0xff] %vm380_vm6, %v505_v3 }
 0x296   : > { %v1079_v7 = vpop.eup %1078  ;;  %885 = vst.msk [vmem:[%s1914_s30 + $0x7] sm:$0x2] %vm399_vm8, %v524_v60  ;;  %v621_v8 = vsel %vm620_vm3, %v1903_v29, %v619_v2  ;;  %v638_v51 = vmul.f32 %v1077_v5, %v1910_v37 }
 0x297   : > { %v567_v10 = vmul.f32 %v1079_v7, %v565_v9  ;;  %v624_v14 = vsel %vm622_vm4, %v623_v53, %v621_v8 }
 0x298   : > { %v640_v11 = vsel %vm639_vm5, %v1910_v37, %v638_v51  ;;  %v1081_v18 = vpop.eup %1080 }
 0x299   : > { %v569_v15 = vsel %vm568_vm7, %v565_v9, %v567_v10  ;;  %v643_v17 = vsel %vm641_vm9, %v642_v12, %v640_v11  ;;  %v686_v20 = vmul.f32 %v1081_v18, %v684_v47 }
 0x29a   : > { %v572_v4 = vsel %vm570_vm10, %v571_v13, %v569_v15 }
 0x29b   : > { %888 = vst.msk [vmem:[%s1934_s28 + $0x8] sm:$0x1] %vm454_vm13, %v572_v4  ;;  %v688_v55 = vsel %vm687_vm11, %v684_v47, %v686_v20 }
 0x29c   : > { %892 = vst.msk [vmem:[%s1914_s30 + $0x10] sm:$0xff] %vm380_vm6, %v624_v14  ;;  %v691_v22 = vsel %vm689_vm12, %v690_v58, %v688_v55 }
 0x29d   : > { %893 = vst.msk [vmem:[%s1914_s30 + $0xf] sm:$0x2] %vm399_vm8, %v643_v17 }
 0x29e   : > { %896 = vst.msk [vmem:[%s1934_s28 + $0x10] sm:$0x1] %vm454_vm13, %v691_v22 }
 0x29f   : > { %1185 = shalt.err (!%p1182_p12)
}
 0x2a0   : > { %s1186_s17 = scalar_lea.hbm %s1974_s8, 384  ;;  %s1190_s0 = scalar_lea.hbm %s2131_s26, 1536 }
 0x2a1   : > { %p1187_p3 = scmp.ne.s32.totalorder %s1974_s8, %s1186_s17  ;;  %p1191_p0 = scmp.lt.u32.totalorder %s1974_s8, %s2131_s26 }
 0x2a2   : > { %p1192_p2 = scmp.lt.u32.totalorder %s1190_s0, %s1186_s17  ;;  %p1194_p4 = scmp.lt.u32.totalorder %s1186_s17, %s1974_s8 }
 0x2a3   : > { %p1188_p7 = pnand %p1187_p3, %p2132_p6 }
 0x2a4   : > { %p1193_p10 = por %p1192_p2, %p1191_p0 }
 0x2a5   : > { %p1189_p1 = pneg %p1188_p7 }
 0x2a6   : > { %p1195_p8 = por %p1194_p4, %p1193_p10 }
 0x2a8   : > { %p1196_p11 = pnand %p1195_p8, %p1189_p1 }
 0x2aa   : > { %1199 = shalt.err (!%p1196_p11)
}
 0x2ab   : > { %s1344_s30 = smov 128   ;;  %s1345_s28 = smov 256  }
 0x2ac   : > { %s1346_s23 = smov 8  }
 0x2ad   : > { %915 = dma.vmem_to_hbm [thread:$0]  (%p2132_p6), %s1965_s10, 384, %s1974_s8, %s695_s6, %s1344_s30, %s1345_s28, %s1346_s23  }
 0x2ae PF: > { %s2133_s22 = sld [smem:[#allocation14_spill]]  ;;  %s2134_s1 = sld [smem:[#allocation22_spill]] }
 0x2af   : > { %p932_p9 = scmp.ge.s32.totalorder %s1330_s25, 2 }
 0x2b4   : > { %s724_s12 = sand.u32 1, %s2133_s22   ;;  %p2135_p13 = scmp.ne.s32.totalorder %s2134_s1, 0 }
 0x2b5   : > { %s725_s3 = scalar_lea.sflag [#allocation4], %s724_s12 }
 0x2b6   : > { %p928_p5 = pnand %p932_p9, %p2135_p13 }
 0x2b8   : > { %1269 = dma.done.wait (!%p928_p5), %s725_s3, 384  }
 0x2b9   : > { %1271 = vsyncadd (!%p928_p5), %s725_s3, 4294966912  ;;  %s22_s25 = sadd.s32 1, %s1330_s25   ;;  %s2137_s4 = sld [smem:[#allocation13_spill]] }
 0x2ba   : > { %p2007_p12 = scmp.ge.s32.totalorder %s22_s25, 6   ;;  %s2138_s17 = sld [smem:[#allocation19_spill]] }
 0x2bb   : > { %s2139_s10 = sld [smem:[#allocation15_spill]]  ;;  %s2140_s20 = sld [smem:[#allocation20_spill]] }
 0x2bc   : > { %s2141_s21 = sld [smem:[#allocation16_spill]]  ;;  %s2142_s23 = sld [smem:[#allocation17_spill]] }
 0x2bd   : > { %s2143_s8 = sld [smem:[#allocation18_spill]]  ;;  %s2144_s12 = smov %s1282_s13 }
 0x2be   : > { %s2145_s13 = smov %s1286_s14  ;;  %s2146_s14 = smov %s1629_s15 }
 0x2bf   : > { %s2147_s15 = smov %s1294_s16  ;;  %s2148_s16 = smov %s2137_s4 }
 0x2c0   : > { %s2149_s18 = smov %s1306_s19  ;;  %s2151_s22 = smov %s1326_s24 }
 0x2c1   : > { %s2150_s19 = smov %s2139_s10  ;;  %21 = sbr.rel (!%p2007_p12) target bundleno = 16 (0x10), region = 118 }
 0x2c3   : > { %s2152_s24 = smov %s2143_s8 }
 0x2c8   :  { %730 = vsyncpa [#allocation3], 1 }
 0x2c9   :  { %732 = vsyncpa [#allocation3 + $0x1], 1 }
 0x2ca   :  { %733 = vsyncpa [#allocation6], 1 }
 0x2cb   :  { %735 = vsyncpa [#allocation6 + $0x1], 1 }
 0x2cc   :  { %736 = vsyncpa [#allocation4], 1 }
 0x2cd   :  { %738 = vsyncpa [#allocation4 + $0x1], 1 }

</bundles_post_ra>
